<compile_context>
chip_gen: v7x
topology: tpu7x:2x2x1
jax: 0.10.0
libtpu: 0.0.40
codegen_flags: <defaults>
</compile_context>

<pallas_src>
import numpy as np
import jax
import jax.numpy as jnp
from jax.experimental import pallas as pl
from jax.experimental.pallas import tpu as pltpu

# module constants (from the experiment file)
N_SAMPLES = 2 ** 14
N_FRAMES = N_SAMPLES // 256        # 64
N_CLUSTERS = 512
MODEL_DIM = 128
KSIZE = 7
PAD = KSIZE // 2
K1_PAD = 8                         # conv1 taps zero-padded 7 -> 8 (aligned contraction)


def _leaky(x):
    # LeakyReLU(0.2): for slope < 1, max(x, 0.2*x) == where(x > 0, x, 0.2*x)
    return jnp.maximum(x, 0.2 * x)


def _fill_taps(src, t_idx, T, scratch_ref):
    """Write the 7-tap im2col of `src` into `scratch_ref` via static lane slices.

    src: (M, C) rows ordered (batch, time), M = TB*T.
    scratch_ref: VMEM ref of shape (M, KSIZE*C); column block k holds src shifted
    so that row (b, t) sees src[b, t + k - PAD, :] (zero outside [0, T)).
    Shifts use pltpu.roll (XLU) on the flattened array + an iota boundary mask;
    packing is done with masked stores (vst slot), not lane-concat shifts.
    """
    M, C = src.shape
    for k in range(KSIZE):
        off = k - PAD
        if off == 0:
            scratch_ref[:, k * C:(k + 1) * C] = src
            continue
        # rolled[m] = src[(m + off) mod M]
        rolled = pltpu.roll(src, shift=(-off) % M, axis=0)
        src_t = t_idx + off
        valid = jnp.logical_and(src_t >= 0, src_t < T).astype(src.dtype)   # (M, 1)
        scratch_ref[:, k * C:(k + 1) * C] = rolled * valid


def _embed_conditioning_kernel(
    taps1_ref, emb_ref,
    w1_ref, b1_ref, w2_ref, b2_ref, w3_ref, b3_ref,
    lw2_ref, lb2_ref, lw3_ref, lb3_ref,
    out_ref,
    s2_ref, s3_ref,
):
    TB, T, _ = taps1_ref.shape
    M = TB * T
    f32 = jnp.float32

    # time index of each row within its batch element
    t_idx = jax.lax.broadcasted_iota(jnp.int32, (M, 1), 0) % T        # (M, 1)

    taps1 = taps1_ref[...].astype(f32).reshape(M, K1_PAD)             # (M, 8) host im2col
    emb_part = emb_ref[...].astype(f32).reshape(M, MODEL_DIM)         # (M, 128) lw1-fused gather

    # ---- EmbedAmp: three "same" conv1d layers, each one im2col matmul -------
    # conv1: taps precomputed host-side; single (M,8)x(8,16) matmul.
    h = _leaky(jnp.dot(taps1, w1_ref[...], preferred_element_type=f32) + b1_ref[...])   # (M, 16)

    # conv2: taps packed into VMEM scratch (static lane-slice stores), one matmul.
    _fill_taps(h, t_idx, T, s2_ref)
    h = _leaky(jnp.dot(s2_ref[...], w2_ref[...], preferred_element_type=f32)
               + b2_ref[...])                                                            # (M, 32)

    # conv3 has lw1's lower half folded into its weights; together with the
    # lw1-fused embedding gather this IS the first Linear(+LReLU) of the stack.
    _fill_taps(h, t_idx, T, s3_ref)
    h = _leaky(jnp.dot(s3_ref[...], w3_ref[...], preferred_element_type=f32)
               + emb_part + b3_ref[...])                                                 # (M, 128)

    # ---- remaining LinearOutputStack layers ---------------------------------
    h = _leaky(jnp.dot(h, lw2_ref[...], preferred_element_type=f32) + lb2_ref[...])
    y = jnp.dot(h, lw3_ref[...], preferred_element_type=f32) + lb3_ref[...]

    out_ref[...] = y.reshape(TB, T, MODEL_DIM)


def embed_conditioning(indices, norms, params, *, batch_block=32):
    """indices: (B, n_frames) int, norms: (B, n_frames) f32 -> (B, n_frames, model_dim)."""
    B = indices.shape[0]
    T = N_FRAMES
    D = MODEL_DIM

    # Keep >= 2 grid blocks so both v7x TensorCores get work; cap the block size.
    TB = int(max(1, min(batch_block, pl.cdiv(B, 2))))
    n_blocks = int(pl.cdiv(B, TB))
    Bp = n_blocks * TB
    M = TB * T

    # ---- host-side prep (cheap XLA ops, off the kernel's critical path) -----
    lw1, lb1 = params["lw1"], params["lb1"]

    # Fold lw1's upper half into the embedding table, gather host-side.
    emb_fused = params["emb"] @ lw1[:D]                                   # (512, 128)
    emb_part = emb_fused[indices.astype(jnp.int32)]                        # (B, T, 128)

    # conv1 im2col precomputed host-side: 7 shifted copies of norms + 1 zero pad tap.
    nrm = norms.astype(jnp.float32)                                        # (B, T)
    nrm_pad = jnp.pad(nrm, ((0, 0), (PAD, PAD)))                           # (B, T+6)
    taps1 = jnp.stack([nrm_pad[:, k:k + T] for k in range(KSIZE)], axis=-1)  # (B, T, 7)
    taps1 = jnp.pad(taps1, ((0, 0), (0, 0), (0, K1_PAD - KSIZE)))          # (B, T, 8)

    if Bp != B:
        emb_part = jnp.pad(emb_part, ((0, Bp - B), (0, 0), (0, 0)))
        taps1 = jnp.pad(taps1, ((0, Bp - B), (0, 0), (0, 0)))

    # Flatten conv taps for the im2col matmuls; fold lw1 lower half + lb1 into conv3.
    w1 = jnp.zeros((K1_PAD, 16), jnp.float32).at[:KSIZE].set(
        params["cw1"].reshape(KSIZE, 16))                                  # (8, 16)
    b1 = params["cb1"].reshape(1, 16)
    w2 = params["cw2"].reshape(KSIZE * 16, 32)                             # (112, 32)
    b2 = params["cb2"].reshape(1, 32)
    w3 = params["cw3"].reshape(KSIZE * 32, D) @ lw1[D:]                    # (224, 128)
    b3 = (params["cb3"] @ lw1[D:] + lb1).reshape(1, D)
    lw2, lb2 = params["lw2"], params["lb2"].reshape(1, D)
    lw3, lb3 = params["lw3"], params["lb3"].reshape(1, D)

    weights = (w1, b1, w2, b2, w3, b3, lw2, lb2, lw3, lb3)

    def full_spec(arr):
        nd = arr.ndim
        return pl.BlockSpec(arr.shape, lambda b, _nd=nd: (0,) * _nd)

    in_specs = [
        pl.BlockSpec((TB, T, K1_PAD), lambda b: (b, 0, 0)),   # conv1 host-side taps
        pl.BlockSpec((TB, T, D), lambda b: (b, 0, 0)),        # lw1-fused embedding gather
    ] + [full_spec(w) for w in weights]
    out_spec = pl.BlockSpec((TB, T, D), lambda b: (b, 0, 0))

    out = pl.pallas_call(
        _embed_conditioning_kernel,
        out_shape=jax.ShapeDtypeStruct((Bp, T, D), jnp.float32),
        grid_spec=pltpu.PrefetchScalarGridSpec(
            num_scalar_prefetch=0,
            grid=(n_blocks,),
            in_specs=in_specs,
            out_specs=out_spec,
            scratch_shapes=[pltpu.VMEM((M, KSIZE * 16), jnp.float32),   # conv2 im2col
                            pltpu.VMEM((M, KSIZE * 32), jnp.float32)],  # conv3 im2col
        ),
        compiler_params=pltpu.CompilerParams(
            dimension_semantics=("parallel",)),
    )(taps1, emb_part, *weights)
    return out[:B]


def reference(indices, norms, params):
    """Pure-JAX reference mirroring the PyTorch forward (channels-last math, unfused)."""
    emb = params["emb"][indices]                                 # (B, T, D)
    x = norms[..., None].astype(jnp.float32)                     # (B, T, 1)

    def conv_same(x, w, b):                                      # w: (K, Cin, Cout)
        T = x.shape[1]
        xp = jnp.pad(x, ((0, 0), (PAD, PAD), (0, 0)))
        out = sum(jnp.einsum("btc,cd->btd", xp[:, k:k + T, :], w[k])
                  for k in range(KSIZE))
        return out + b

    def lrelu(x):
        return jnp.where(x > 0, x, 0.2 * x)

    h = lrelu(conv_same(x, params["cw1"], params["cb1"]))
    h = lrelu(conv_same(h, params["cw2"], params["cb2"]))
    amp = conv_same(h, params["cw3"], params["cb3"])             # (B, T, D)

    cat = jnp.concatenate([emb, amp], axis=-1)                   # (B, T, 2D)
    h = lrelu(cat @ params["lw1"] + params["lb1"])
    h = lrelu(h @ params["lw2"] + params["lb2"])
    return h @ params["lw3"] + params["lb3"]


def init_params(key):
    ks = jax.random.split(key, 13)
    s = 0.05
    return {
        "emb": jax.random.normal(ks[0], (N_CLUSTERS, MODEL_DIM), jnp.float32) * s,
        "cw1": jax.random.normal(ks[1], (KSIZE, 1, 16), jnp.float32) * s,
        "cb1": jax.random.normal(ks[2], (16,), jnp.float32) * s,
        "cw2": jax.random.normal(ks[3], (KSIZE, 16, 32), jnp.float32) * s,
        "cb2": jax.random.normal(ks[4], (32,), jnp.float32) * s,
        "cw3": jax.random.normal(ks[5], (KSIZE, 32, MODEL_DIM), jnp.float32) * s,
        "cb3": jax.random.normal(ks[6], (MODEL_DIM,), jnp.float32) * s,
        "lw1": jax.random.normal(ks[7], (2 * MODEL_DIM, MODEL_DIM), jnp.float32) * s,
        "lb1": jax.random.normal(ks[8], (MODEL_DIM,), jnp.float32) * s,
        "lw2": jax.random.normal(ks[9], (MODEL_DIM, MODEL_DIM), jnp.float32) * s,
        "lb2": jax.random.normal(ks[10], (MODEL_DIM,), jnp.float32) * s,
        "lw3": jax.random.normal(ks[11], (MODEL_DIM, MODEL_DIM), jnp.float32) * s,
        "lb3": jax.random.normal(ks[12], (MODEL_DIM,), jnp.float32) * s,
    }


if __name__ == "__main__":
    key = jax.random.PRNGKey(0)
    k_idx, k_nrm, k_par = jax.random.split(key, 3)
    params = init_params(k_par)

    # Case 1: small batch -> TB=1, 2 grid blocks (both v7x cores active).
    B = 2
    indices = jax.random.randint(k_idx, (B, N_FRAMES), 0, N_CLUSTERS, dtype=jnp.int32)
    norms = jax.random.uniform(k_nrm, (B, N_FRAMES), dtype=jnp.float32)

    out = jax.block_until_ready(embed_conditioning(indices, norms, params))
    ref = jax.block_until_ready(reference(indices, norms, params))
    assert out.shape == (B, N_FRAMES, MODEL_DIM), out.shape
    # tolerance covers the host-side lw1 fusion reassociation + MXU default precision
    np.testing.assert_allclose(np.asarray(out), np.asarray(ref), rtol=2e-3, atol=2e-3)

    # Case 2: batch not divisible by the block -> exercises padding + multi-step grid.
    B2 = 3
    indices2 = jax.random.randint(jax.random.PRNGKey(1), (B2, N_FRAMES), 0,
                                  N_CLUSTERS, dtype=jnp.int32)
    norms2 = jax.random.uniform(jax.random.PRNGKey(2), (B2, N_FRAMES), dtype=jnp.float32)
    out2 = jax.block_until_ready(embed_conditioning(indices2, norms2, params, batch_block=2))
    ref2 = jax.block_until_ready(reference(indices2, norms2, params))
    np.testing.assert_allclose(np.asarray(out2), np.asarray(ref2), rtol=2e-3, atol=2e-3)

    print("KERNEL_OK")
</pallas_src>

<mosaic_0001>
module attributes {stable_mosaic.version = 11 : i64} {
  func.func @_embed_conditioning_kernel(%arg0: i32, %arg1: memref<1x64x8xf32, #tpu.memory_space<vmem>>, %arg2: memref<1x64x128xf32, #tpu.memory_space<vmem>>, %arg3: memref<8x16xf32, #tpu.memory_space<vmem>>, %arg4: memref<1x16xf32, #tpu.memory_space<vmem>>, %arg5: memref<112x32xf32, #tpu.memory_space<vmem>>, %arg6: memref<1x32xf32, #tpu.memory_space<vmem>>, %arg7: memref<224x128xf32, #tpu.memory_space<vmem>>, %arg8: memref<1x128xf32, #tpu.memory_space<vmem>>, %arg9: memref<128x128xf32, #tpu.memory_space<vmem>>, %arg10: memref<1x128xf32, #tpu.memory_space<vmem>>, %arg11: memref<128x128xf32, #tpu.memory_space<vmem>>, %arg12: memref<1x128xf32, #tpu.memory_space<vmem>>, %arg13: memref<1x64x128xf32, #tpu.memory_space<vmem>>, %arg14: memref<64x112xf32, #tpu.memory_space<vmem>>, %arg15: memref<64x224xf32, #tpu.memory_space<vmem>>) attributes {dimension_semantics = [#tpu.dimension_semantics<parallel>], iteration_bounds = array<i64: 2>, scalar_prefetch = 0 : i64, scratch_operands = 2 : i64, tpu.core_type = #tpu.core_type<tc>, window_params = [{transform_indices = @transform_0, window_bounds = array<i64: 1, 64, 8>}, {transform_indices = @transform_1, window_bounds = array<i64: 1, 64, 128>}, {pipeline_mode = #tpu.pipeline_mode<synchronous>, transform_indices = @transform_2, window_bounds = array<i64: 8, 16>}, {pipeline_mode = #tpu.pipeline_mode<synchronous>, transform_indices = @transform_3, window_bounds = array<i64: 1, 16>}, {pipeline_mode = #tpu.pipeline_mode<synchronous>, transform_indices = @transform_4, window_bounds = array<i64: 112, 32>}, {pipeline_mode = #tpu.pipeline_mode<synchronous>, transform_indices = @transform_5, window_bounds = array<i64: 1, 32>}, {pipeline_mode = #tpu.pipeline_mode<synchronous>, transform_indices = @transform_6, window_bounds = array<i64: 224, 128>}, {pipeline_mode = #tpu.pipeline_mode<synchronous>, transform_indices = @transform_7, window_bounds = array<i64: 1, 128>}, {pipeline_mode = #tpu.pipeline_mode<synchronous>, transform_indices = @transform_8, window_bounds = array<i64: 128, 128>}, {pipeline_mode = #tpu.pipeline_mode<synchronous>, transform_indices = @transform_9, window_bounds = array<i64: 1, 128>}, {pipeline_mode = #tpu.pipeline_mode<synchronous>, transform_indices = @transform_10, window_bounds = array<i64: 128, 128>}, {pipeline_mode = #tpu.pipeline_mode<synchronous>, transform_indices = @transform_11, window_bounds = array<i64: 1, 128>}, {transform_indices = @transform_12, window_bounds = array<i64: 1, 64, 128>}]} {
    %0 = tpu.iota {dimensions = array<i32: 0>} : vector<64x1xi32>
    %c64_i32 = arith.constant 64 : i32
    %c0_i32 = arith.constant 0 : i32
    %1 = arith.cmpi eq, %c64_i32, %c0_i32 : i32
    %c1_i32 = arith.constant 1 : i32
    %2 = arith.select %1, %c1_i32, %c64_i32 : i32
    %3 = vector.broadcast %2 : i32 to vector<64x1xi32>
    %4 = arith.remsi %0, %3 : vector<64x1xi32>
    %c0_i32_0 = arith.constant 0 : i32
    %5 = vector.broadcast %c0_i32_0 : i32 to vector<64x1xi32>
    %6 = arith.cmpi ne, %4, %5 : vector<64x1xi32>
    %c0_i32_1 = arith.constant 0 : i32
    %7 = vector.broadcast %c0_i32_1 : i32 to vector<64x1xi32>
    %8 = arith.cmpi slt, %4, %7 : vector<64x1xi32>
    %c0_i32_2 = arith.constant 0 : i32
    %9 = arith.cmpi slt, %2, %c0_i32_2 : i32
    %10 = vector.broadcast %9 : i1 to vector<64x1xi1>
    %11 = vector.broadcast %10 : vector<64x1xi1> to vector<64x1xi1>
    %12 = arith.xori %8, %11 : vector<64x1xi1>
    %13 = arith.andi %12, %6 : vector<64x1xi1>
    %14 = vector.broadcast %2 : i32 to vector<64x1xi32>
    %15 = arith.addi %4, %14 : vector<64x1xi32>
    %16 = arith.select %13, %15, %4 : vector<64x1xi1>, vector<64x1xi32>
    %c0 = arith.constant 0 : index
    %c0_3 = arith.constant 0 : index
    %c0_4 = arith.constant 0 : index
    %17 = vector.load %arg1[%c0, %c0_3, %c0_4] : memref<1x64x8xf32, #tpu.memory_space<vmem>>, vector<1x64x8xf32>
    %18 = vector.shape_cast %17 : vector<1x64x8xf32> to vector<64x8xf32>
    %c0_5 = arith.constant 0 : index
    %c0_6 = arith.constant 0 : index
    %c0_7 = arith.constant 0 : index
    %19 = vector.load %arg2[%c0_5, %c0_6, %c0_7] : memref<1x64x128xf32, #tpu.memory_space<vmem>>, vector<1x64x128xf32>
    %20 = vector.shape_cast %19 : vector<1x64x128xf32> to vector<64x128xf32>
    %c0_8 = arith.constant 0 : index
    %c0_9 = arith.constant 0 : index
    %21 = vector.load %arg3[%c0_8, %c0_9] : memref<8x16xf32, #tpu.memory_space<vmem>>, vector<8x16xf32>
    %cst = arith.constant dense<0.000000e+00> : vector<64x16xf32>
    %22 = tpu.matmul %18, %21, %cst {dimension_numbers = #tpu.dot_dimension_numbers<[1], [0], [0], [1], [0, 0, 1, 1], [], []>} : vector<64x8xf32>, vector<8x16xf32>, vector<64x16xf32> -> vector<64x16xf32>
    %c0_10 = arith.constant 0 : index
    %c0_11 = arith.constant 0 : index
    %23 = vector.load %arg4[%c0_10, %c0_11] : memref<1x16xf32, #tpu.memory_space<vmem>>, vector<1x16xf32>
    %24 = vector.broadcast %23 : vector<1x16xf32> to vector<64x16xf32>
    %25 = arith.addf %22, %24 : vector<64x16xf32>
    %cst_12 = arith.constant 2.000000e-01 : f32
    %26 = vector.broadcast %cst_12 : f32 to vector<64x16xf32>
    %27 = arith.mulf %26, %25 : vector<64x16xf32>
    %28 = arith.maximumf %25, %27 : vector<64x16xf32>
    %c3_i32 = arith.constant 3 : i32
    %29 = tpu.dynamic_rotate %28 by %c3_i32 dim 0 : vector<64x16xf32>, i32 -> vector<64x16xf32>
    %c-3_i32 = arith.constant -3 : i32
    %30 = vector.broadcast %c-3_i32 : i32 to vector<64x1xi32>
    %31 = arith.addi %16, %30 : vector<64x1xi32>
    %c0_i32_13 = arith.constant 0 : i32
    %32 = vector.broadcast %c0_i32_13 : i32 to vector<64x1xi32>
    %33 = arith.cmpi sge, %31, %32 : vector<64x1xi32>
    %c64_i32_14 = arith.constant 64 : i32
    %34 = vector.broadcast %c64_i32_14 : i32 to vector<64x1xi32>
    %35 = arith.cmpi slt, %31, %34 : vector<64x1xi32>
    %36 = arith.andi %33, %35 : vector<64x1xi1>
    %37 = arith.extui %36 : vector<64x1xi1> to vector<64x1xi32>
    %38 = arith.sitofp %37 : vector<64x1xi32> to vector<64x1xf32>
    %39 = vector.broadcast %38 : vector<64x1xf32> to vector<64x16xf32>
    %40 = arith.mulf %29, %39 : vector<64x16xf32>
    %c0_15 = arith.constant 0 : index
    %c0_16 = arith.constant 0 : index
    %41 = vector.load %arg14[%c0_15, %c0_16] : memref<64x112xf32, #tpu.memory_space<vmem>>, vector<64x16xf32>
    tpu.vector_store %arg14[%c0_15, %c0_16], %40 {strides = array<i32>} : memref<64x112xf32, #tpu.memory_space<vmem>>, vector<64x16xf32>,
    %c2_i32 = arith.constant 2 : i32
    %42 = tpu.dynamic_rotate %28 by %c2_i32 dim 0 : vector<64x16xf32>, i32 -> vector<64x16xf32>
    %c-2_i32 = arith.constant -2 : i32
    %43 = vector.broadcast %c-2_i32 : i32 to vector<64x1xi32>
    %44 = arith.addi %16, %43 : vector<64x1xi32>
    %c0_i32_17 = arith.constant 0 : i32
    %45 = vector.broadcast %c0_i32_17 : i32 to vector<64x1xi32>
    %46 = arith.cmpi sge, %44, %45 : vector<64x1xi32>
    %c64_i32_18 = arith.constant 64 : i32
    %47 = vector.broadcast %c64_i32_18 : i32 to vector<64x1xi32>
    %48 = arith.cmpi slt, %44, %47 : vector<64x1xi32>
    %49 = arith.andi %46, %48 : vector<64x1xi1>
    %50 = arith.extui %49 : vector<64x1xi1> to vector<64x1xi32>
    %51 = arith.sitofp %50 : vector<64x1xi32> to vector<64x1xf32>
    %52 = vector.broadcast %51 : vector<64x1xf32> to vector<64x16xf32>
    %53 = arith.mulf %42, %52 : vector<64x16xf32>
    %c0_19 = arith.constant 0 : index
    %c16 = arith.constant 16 : index
    %54 = vector.load %arg14[%c0_19, %c16] : memref<64x112xf32, #tpu.memory_space<vmem>>, vector<64x16xf32>
    tpu.vector_store %arg14[%c0_19, %c16], %53 {strides = array<i32>} : memref<64x112xf32, #tpu.memory_space<vmem>>, vector<64x16xf32>,
    %c1_i32_20 = arith.constant 1 : i32
    %55 = tpu.dynamic_rotate %28 by %c1_i32_20 dim 0 : vector<64x16xf32>, i32 -> vector<64x16xf32>
    %c-1_i32 = arith.constant -1 : i32
    %56 = vector.broadcast %c-1_i32 : i32 to vector<64x1xi32>
    %57 = arith.addi %16, %56 : vector<64x1xi32>
    %c0_i32_21 = arith.constant 0 : i32
    %58 = vector.broadcast %c0_i32_21 : i32 to vector<64x1xi32>
    %59 = arith.cmpi sge, %57, %58 : vector<64x1xi32>
    %c64_i32_22 = arith.constant 64 : i32
    %60 = vector.broadcast %c64_i32_22 : i32 to vector<64x1xi32>
    %61 = arith.cmpi slt, %57, %60 : vector<64x1xi32>
    %62 = arith.andi %59, %61 : vector<64x1xi1>
    %63 = arith.extui %62 : vector<64x1xi1> to vector<64x1xi32>
    %64 = arith.sitofp %63 : vector<64x1xi32> to vector<64x1xf32>
    %65 = vector.broadcast %64 : vector<64x1xf32> to vector<64x16xf32>
    %66 = arith.mulf %55, %65 : vector<64x16xf32>
    %c0_23 = arith.constant 0 : index
    %c32 = arith.constant 32 : index
    %67 = vector.load %arg14[%c0_23, %c32] : memref<64x112xf32, #tpu.memory_space<vmem>>, vector<64x16xf32>
    tpu.vector_store %arg14[%c0_23, %c32], %66 {strides = array<i32>} : memref<64x112xf32, #tpu.memory_space<vmem>>, vector<64x16xf32>,
    %c0_24 = arith.constant 0 : index
    %c48 = arith.constant 48 : index
    %68 = vector.load %arg14[%c0_24, %c48] : memref<64x112xf32, #tpu.memory_space<vmem>>, vector<64x16xf32>
    tpu.vector_store %arg14[%c0_24, %c48], %28 {strides = array<i32>} : memref<64x112xf32, #tpu.memory_space<vmem>>, vector<64x16xf32>,
    %c63_i32 = arith.constant 63 : i32
    %69 = tpu.dynamic_rotate %28 by %c63_i32 dim 0 : vector<64x16xf32>, i32 -> vector<64x16xf32>
    %c1_i32_25 = arith.constant 1 : i32
    %70 = vector.broadcast %c1_i32_25 : i32 to vector<64x1xi32>
    %71 = arith.addi %16, %70 : vector<64x1xi32>
    %c0_i32_26 = arith.constant 0 : i32
    %72 = vector.broadcast %c0_i32_26 : i32 to vector<64x1xi32>
    %73 = arith.cmpi sge, %71, %72 : vector<64x1xi32>
    %c64_i32_27 = arith.constant 64 : i32
    %74 = vector.broadcast %c64_i32_27 : i32 to vector<64x1xi32>
    %75 = arith.cmpi slt, %71, %74 : vector<64x1xi32>
    %76 = arith.andi %73, %75 : vector<64x1xi1>
    %77 = arith.extui %76 : vector<64x1xi1> to vector<64x1xi32>
    %78 = arith.sitofp %77 : vector<64x1xi32> to vector<64x1xf32>
    %79 = vector.broadcast %78 : vector<64x1xf32> to vector<64x16xf32>
    %80 = arith.mulf %69, %79 : vector<64x16xf32>
    %c0_28 = arith.constant 0 : index
    %c64 = arith.constant 64 : index
    %81 = vector.load %arg14[%c0_28, %c64] : memref<64x112xf32, #tpu.memory_space<vmem>>, vector<64x16xf32>
    tpu.vector_store %arg14[%c0_28, %c64], %80 {strides = array<i32>} : memref<64x112xf32, #tpu.memory_space<vmem>>, vector<64x16xf32>,
    %c62_i32 = arith.constant 62 : i32
    %82 = tpu.dynamic_rotate %28 by %c62_i32 dim 0 : vector<64x16xf32>, i32 -> vector<64x16xf32>
    %c2_i32_29 = arith.constant 2 : i32
    %83 = vector.broadcast %c2_i32_29 : i32 to vector<64x1xi32>
    %84 = arith.addi %16, %83 : vector<64x1xi32>
    %c0_i32_30 = arith.constant 0 : i32
    %85 = vector.broadcast %c0_i32_30 : i32 to vector<64x1xi32>
    %86 = arith.cmpi sge, %84, %85 : vector<64x1xi32>
    %c64_i32_31 = arith.constant 64 : i32
    %87 = vector.broadcast %c64_i32_31 : i32 to vector<64x1xi32>
    %88 = arith.cmpi slt, %84, %87 : vector<64x1xi32>
    %89 = arith.andi %86, %88 : vector<64x1xi1>
    %90 = arith.extui %89 : vector<64x1xi1> to vector<64x1xi32>
    %91 = arith.sitofp %90 : vector<64x1xi32> to vector<64x1xf32>
    %92 = vector.broadcast %91 : vector<64x1xf32> to vector<64x16xf32>
    %93 = arith.mulf %82, %92 : vector<64x16xf32>
    %c0_32 = arith.constant 0 : index
    %c80 = arith.constant 80 : index
    %94 = vector.load %arg14[%c0_32, %c80] : memref<64x112xf32, #tpu.memory_space<vmem>>, vector<64x16xf32>
    tpu.vector_store %arg14[%c0_32, %c80], %93 {strides = array<i32>} : memref<64x112xf32, #tpu.memory_space<vmem>>, vector<64x16xf32>,
    %c61_i32 = arith.constant 61 : i32
    %95 = tpu.dynamic_rotate %28 by %c61_i32 dim 0 : vector<64x16xf32>, i32 -> vector<64x16xf32>
    %c3_i32_33 = arith.constant 3 : i32
    %96 = vector.broadcast %c3_i32_33 : i32 to vector<64x1xi32>
    %97 = arith.addi %16, %96 : vector<64x1xi32>
    %c0_i32_34 = arith.constant 0 : i32
    %98 = vector.broadcast %c0_i32_34 : i32 to vector<64x1xi32>
    %99 = arith.cmpi sge, %97, %98 : vector<64x1xi32>
    %c64_i32_35 = arith.constant 64 : i32
    %100 = vector.broadcast %c64_i32_35 : i32 to vector<64x1xi32>
    %101 = arith.cmpi slt, %97, %100 : vector<64x1xi32>
    %102 = arith.andi %99, %101 : vector<64x1xi1>
    %103 = arith.extui %102 : vector<64x1xi1> to vector<64x1xi32>
    %104 = arith.sitofp %103 : vector<64x1xi32> to vector<64x1xf32>
    %105 = vector.broadcast %104 : vector<64x1xf32> to vector<64x16xf32>
    %106 = arith.mulf %95, %105 : vector<64x16xf32>
    %c0_36 = arith.constant 0 : index
    %c96 = arith.constant 96 : index
    %107 = vector.load %arg14[%c0_36, %c96] : memref<64x112xf32, #tpu.memory_space<vmem>>, vector<64x16xf32>
    tpu.vector_store %arg14[%c0_36, %c96], %106 {strides = array<i32>} : memref<64x112xf32, #tpu.memory_space<vmem>>, vector<64x16xf32>,
    %c0_37 = arith.constant 0 : index
    %c0_38 = arith.constant 0 : index
    %108 = vector.load %arg14[%c0_37, %c0_38] : memref<64x112xf32, #tpu.memory_space<vmem>>, vector<64x112xf32>
    %c0_39 = arith.constant 0 : index
    %c0_40 = arith.constant 0 : index
    %109 = vector.load %arg5[%c0_39, %c0_40] : memref<112x32xf32, #tpu.memory_space<vmem>>, vector<112x32xf32>
    %cst_41 = arith.constant dense<0.000000e+00> : vector<64x32xf32>
    %110 = tpu.matmul %108, %109, %cst_41 {dimension_numbers = #tpu.dot_dimension_numbers<[1], [0], [0], [1], [0, 0, 1, 1], [], []>} : vector<64x112xf32>, vector<112x32xf32>, vector<64x32xf32> -> vector<64x32xf32>
    %c0_42 = arith.constant 0 : index
    %c0_43 = arith.constant 0 : index
    %111 = vector.load %arg6[%c0_42, %c0_43] : memref<1x32xf32, #tpu.memory_space<vmem>>, vector<1x32xf32>
    %112 = vector.broadcast %111 : vector<1x32xf32> to vector<64x32xf32>
    %113 = arith.addf %110, %112 : vector<64x32xf32>
    %cst_44 = arith.constant 2.000000e-01 : f32
    %114 = vector.broadcast %cst_44 : f32 to vector<64x32xf32>
    %115 = arith.mulf %114, %113 : vector<64x32xf32>
    %116 = arith.maximumf %113, %115 : vector<64x32xf32>
    %c3_i32_45 = arith.constant 3 : i32
    %117 = tpu.dynamic_rotate %116 by %c3_i32_45 dim 0 : vector<64x32xf32>, i32 -> vector<64x32xf32>
    %c-3_i32_46 = arith.constant -3 : i32
    %118 = vector.broadcast %c-3_i32_46 : i32 to vector<64x1xi32>
    %119 = arith.addi %16, %118 : vector<64x1xi32>
    %c0_i32_47 = arith.constant 0 : i32
    %120 = vector.broadcast %c0_i32_47 : i32 to vector<64x1xi32>
    %121 = arith.cmpi sge, %119, %120 : vector<64x1xi32>
    %c64_i32_48 = arith.constant 64 : i32
    %122 = vector.broadcast %c64_i32_48 : i32 to vector<64x1xi32>
    %123 = arith.cmpi slt, %119, %122 : vector<64x1xi32>
    %124 = arith.andi %121, %123 : vector<64x1xi1>
    %125 = arith.extui %124 : vector<64x1xi1> to vector<64x1xi32>
    %126 = arith.sitofp %125 : vector<64x1xi32> to vector<64x1xf32>
    %127 = vector.broadcast %126 : vector<64x1xf32> to vector<64x32xf32>
    %128 = arith.mulf %117, %127 : vector<64x32xf32>
    %c0_49 = arith.constant 0 : index
    %c0_50 = arith.constant 0 : index
    %129 = vector.load %arg15[%c0_49, %c0_50] : memref<64x224xf32, #tpu.memory_space<vmem>>, vector<64x32xf32>
    tpu.vector_store %arg15[%c0_49, %c0_50], %128 {strides = array<i32>} : memref<64x224xf32, #tpu.memory_space<vmem>>, vector<64x32xf32>,
    %c2_i32_51 = arith.constant 2 : i32
    %130 = tpu.dynamic_rotate %116 by %c2_i32_51 dim 0 : vector<64x32xf32>, i32 -> vector<64x32xf32>
    %c-2_i32_52 = arith.constant -2 : i32
    %131 = vector.broadcast %c-2_i32_52 : i32 to vector<64x1xi32>
    %132 = arith.addi %16, %131 : vector<64x1xi32>
    %c0_i32_53 = arith.constant 0 : i32
    %133 = vector.broadcast %c0_i32_53 : i32 to vector<64x1xi32>
    %134 = arith.cmpi sge, %132, %133 : vector<64x1xi32>
    %c64_i32_54 = arith.constant 64 : i32
    %135 = vector.broadcast %c64_i32_54 : i32 to vector<64x1xi32>
    %136 = arith.cmpi slt, %132, %135 : vector<64x1xi32>
    %137 = arith.andi %134, %136 : vector<64x1xi1>
    %138 = arith.extui %137 : vector<64x1xi1> to vector<64x1xi32>
    %139 = arith.sitofp %138 : vector<64x1xi32> to vector<64x1xf32>
    %140 = vector.broadcast %139 : vector<64x1xf32> to vector<64x32xf32>
    %141 = arith.mulf %130, %140 : vector<64x32xf32>
    %c0_55 = arith.constant 0 : index
    %c32_56 = arith.constant 32 : index
    %142 = vector.load %arg15[%c0_55, %c32_56] : memref<64x224xf32, #tpu.memory_space<vmem>>, vector<64x32xf32>
    tpu.vector_store %arg15[%c0_55, %c32_56], %141 {strides = array<i32>} : memref<64x224xf32, #tpu.memory_space<vmem>>, vector<64x32xf32>,
    %c1_i32_57 = arith.constant 1 : i32
    %143 = tpu.dynamic_rotate %116 by %c1_i32_57 dim 0 : vector<64x32xf32>, i32 -> vector<64x32xf32>
    %c-1_i32_58 = arith.constant -1 : i32
    %144 = vector.broadcast %c-1_i32_58 : i32 to vector<64x1xi32>
    %145 = arith.addi %16, %144 : vector<64x1xi32>
    %c0_i32_59 = arith.constant 0 : i32
    %146 = vector.broadcast %c0_i32_59 : i32 to vector<64x1xi32>
    %147 = arith.cmpi sge, %145, %146 : vector<64x1xi32>
    %c64_i32_60 = arith.constant 64 : i32
    %148 = vector.broadcast %c64_i32_60 : i32 to vector<64x1xi32>
    %149 = arith.cmpi slt, %145, %148 : vector<64x1xi32>
    %150 = arith.andi %147, %149 : vector<64x1xi1>
    %151 = arith.extui %150 : vector<64x1xi1> to vector<64x1xi32>
    %152 = arith.sitofp %151 : vector<64x1xi32> to vector<64x1xf32>
    %153 = vector.broadcast %152 : vector<64x1xf32> to vector<64x32xf32>
    %154 = arith.mulf %143, %153 : vector<64x32xf32>
    %c0_61 = arith.constant 0 : index
    %c64_62 = arith.constant 64 : index
    %155 = vector.load %arg15[%c0_61, %c64_62] : memref<64x224xf32, #tpu.memory_space<vmem>>, vector<64x32xf32>
    tpu.vector_store %arg15[%c0_61, %c64_62], %154 {strides = array<i32>} : memref<64x224xf32, #tpu.memory_space<vmem>>, vector<64x32xf32>,
    %c0_63 = arith.constant 0 : index
    %c96_64 = arith.constant 96 : index
    %156 = vector.load %arg15[%c0_63, %c96_64] : memref<64x224xf32, #tpu.memory_space<vmem>>, vector<64x32xf32>
    tpu.vector_store %arg15[%c0_63, %c96_64], %116 {strides = array<i32>} : memref<64x224xf32, #tpu.memory_space<vmem>>, vector<64x32xf32>,
    %c63_i32_65 = arith.constant 63 : i32
    %157 = tpu.dynamic_rotate %116 by %c63_i32_65 dim 0 : vector<64x32xf32>, i32 -> vector<64x32xf32>
    %c1_i32_66 = arith.constant 1 : i32
    %158 = vector.broadcast %c1_i32_66 : i32 to vector<64x1xi32>
    %159 = arith.addi %16, %158 : vector<64x1xi32>
    %c0_i32_67 = arith.constant 0 : i32
    %160 = vector.broadcast %c0_i32_67 : i32 to vector<64x1xi32>
    %161 = arith.cmpi sge, %159, %160 : vector<64x1xi32>
    %c64_i32_68 = arith.constant 64 : i32
    %162 = vector.broadcast %c64_i32_68 : i32 to vector<64x1xi32>
    %163 = arith.cmpi slt, %159, %162 : vector<64x1xi32>
    %164 = arith.andi %161, %163 : vector<64x1xi1>
    %165 = arith.extui %164 : vector<64x1xi1> to vector<64x1xi32>
    %166 = arith.sitofp %165 : vector<64x1xi32> to vector<64x1xf32>
    %167 = vector.broadcast %166 : vector<64x1xf32> to vector<64x32xf32>
    %168 = arith.mulf %157, %167 : vector<64x32xf32>
    %c0_69 = arith.constant 0 : index
    %c128 = arith.constant 128 : index
    %169 = vector.load %arg15[%c0_69, %c128] : memref<64x224xf32, #tpu.memory_space<vmem>>, vector<64x32xf32>
    tpu.vector_store %arg15[%c0_69, %c128], %168 {strides = array<i32>} : memref<64x224xf32, #tpu.memory_space<vmem>>, vector<64x32xf32>,
    %c62_i32_70 = arith.constant 62 : i32
    %170 = tpu.dynamic_rotate %116 by %c62_i32_70 dim 0 : vector<64x32xf32>, i32 -> vector<64x32xf32>
    %c2_i32_71 = arith.constant 2 : i32
    %171 = vector.broadcast %c2_i32_71 : i32 to vector<64x1xi32>
    %172 = arith.addi %16, %171 : vector<64x1xi32>
    %c0_i32_72 = arith.constant 0 : i32
    %173 = vector.broadcast %c0_i32_72 : i32 to vector<64x1xi32>
    %174 = arith.cmpi sge, %172, %173 : vector<64x1xi32>
    %c64_i32_73 = arith.constant 64 : i32
    %175 = vector.broadcast %c64_i32_73 : i32 to vector<64x1xi32>
    %176 = arith.cmpi slt, %172, %175 : vector<64x1xi32>
    %177 = arith.andi %174, %176 : vector<64x1xi1>
    %178 = arith.extui %177 : vector<64x1xi1> to vector<64x1xi32>
    %179 = arith.sitofp %178 : vector<64x1xi32> to vector<64x1xf32>
    %180 = vector.broadcast %179 : vector<64x1xf32> to vector<64x32xf32>
    %181 = arith.mulf %170, %180 : vector<64x32xf32>
    %c0_74 = arith.constant 0 : index
    %c160 = arith.constant 160 : index
    %182 = vector.load %arg15[%c0_74, %c160] : memref<64x224xf32, #tpu.memory_space<vmem>>, vector<64x32xf32>
    tpu.vector_store %arg15[%c0_74, %c160], %181 {strides = array<i32>} : memref<64x224xf32, #tpu.memory_space<vmem>>, vector<64x32xf32>,
    %c61_i32_75 = arith.constant 61 : i32
    %183 = tpu.dynamic_rotate %116 by %c61_i32_75 dim 0 : vector<64x32xf32>, i32 -> vector<64x32xf32>
    %c3_i32_76 = arith.constant 3 : i32
    %184 = vector.broadcast %c3_i32_76 : i32 to vector<64x1xi32>
    %185 = arith.addi %16, %184 : vector<64x1xi32>
    %c0_i32_77 = arith.constant 0 : i32
    %186 = vector.broadcast %c0_i32_77 : i32 to vector<64x1xi32>
    %187 = arith.cmpi sge, %185, %186 : vector<64x1xi32>
    %c64_i32_78 = arith.constant 64 : i32
    %188 = vector.broadcast %c64_i32_78 : i32 to vector<64x1xi32>
    %189 = arith.cmpi slt, %185, %188 : vector<64x1xi32>
    %190 = arith.andi %187, %189 : vector<64x1xi1>
    %191 = arith.extui %190 : vector<64x1xi1> to vector<64x1xi32>
    %192 = arith.sitofp %191 : vector<64x1xi32> to vector<64x1xf32>
    %193 = vector.broadcast %192 : vector<64x1xf32> to vector<64x32xf32>
    %194 = arith.mulf %183, %193 : vector<64x32xf32>
    %c0_79 = arith.constant 0 : index
    %c192 = arith.constant 192 : index
    %195 = vector.load %arg15[%c0_79, %c192] : memref<64x224xf32, #tpu.memory_space<vmem>>, vector<64x32xf32>
    tpu.vector_store %arg15[%c0_79, %c192], %194 {strides = array<i32>} : memref<64x224xf32, #tpu.memory_space<vmem>>, vector<64x32xf32>,
    %c0_80 = arith.constant 0 : index
    %c0_81 = arith.constant 0 : index
    %196 = vector.load %arg15[%c0_80, %c0_81] : memref<64x224xf32, #tpu.memory_space<vmem>>, vector<64x224xf32>
    %c0_82 = arith.constant 0 : index
    %c0_83 = arith.constant 0 : index
    %197 = vector.load %arg7[%c0_82, %c0_83] : memref<224x128xf32, #tpu.memory_space<vmem>>, vector<224x128xf32>
    %cst_84 = arith.constant dense<0.000000e+00> : vector<64x128xf32>
    %198 = tpu.matmul %196, %197, %cst_84 {dimension_numbers = #tpu.dot_dimension_numbers<[1], [0], [0], [1], [0, 0, 1, 1], [], []>} : vector<64x224xf32>, vector<224x128xf32>, vector<64x128xf32> -> vector<64x128xf32>
    %199 = arith.addf %198, %20 : vector<64x128xf32>
    %c0_85 = arith.constant 0 : index
    %c0_86 = arith.constant 0 : index
    %200 = vector.load %arg8[%c0_85, %c0_86] : memref<1x128xf32, #tpu.memory_space<vmem>>, vector<1x128xf32>
    %201 = vector.broadcast %200 : vector<1x128xf32> to vector<64x128xf32>
    %202 = arith.addf %199, %201 : vector<64x128xf32>
    %cst_87 = arith.constant 2.000000e-01 : f32
    %203 = vector.broadcast %cst_87 : f32 to vector<64x128xf32>
    %204 = arith.mulf %203, %202 : vector<64x128xf32>
    %205 = arith.maximumf %202, %204 : vector<64x128xf32>
    %c0_88 = arith.constant 0 : index
    %c0_89 = arith.constant 0 : index
    %206 = vector.load %arg9[%c0_88, %c0_89] : memref<128x128xf32, #tpu.memory_space<vmem>>, vector<128x128xf32>
    %cst_90 = arith.constant dense<0.000000e+00> : vector<64x128xf32>
    %207 = tpu.matmul %205, %206, %cst_90 {dimension_numbers = #tpu.dot_dimension_numbers<[1], [0], [0], [1], [0, 0, 1, 1], [], []>} : vector<64x128xf32>, vector<128x128xf32>, vector<64x128xf32> -> vector<64x128xf32>
    %c0_91 = arith.constant 0 : index
    %c0_92 = arith.constant 0 : index
    %208 = vector.load %arg10[%c0_91, %c0_92] : memref<1x128xf32, #tpu.memory_space<vmem>>, vector<1x128xf32>
    %209 = vector.broadcast %208 : vector<1x128xf32> to vector<64x128xf32>
    %210 = arith.addf %207, %209 : vector<64x128xf32>
    %cst_93 = arith.constant 2.000000e-01 : f32
    %211 = vector.broadcast %cst_93 : f32 to vector<64x128xf32>
    %212 = arith.mulf %211, %210 : vector<64x128xf32>
    %213 = arith.maximumf %210, %212 : vector<64x128xf32>
    %c0_94 = arith.constant 0 : index
    %c0_95 = arith.constant 0 : index
    %214 = vector.load %arg11[%c0_94, %c0_95] : memref<128x128xf32, #tpu.memory_space<vmem>>, vector<128x128xf32>
    %cst_96 = arith.constant dense<0.000000e+00> : vector<64x128xf32>
    %215 = tpu.matmul %213, %214, %cst_96 {dimension_numbers = #tpu.dot_dimension_numbers<[1], [0], [0], [1], [0, 0, 1, 1], [], []>} : vector<64x128xf32>, vector<128x128xf32>, vector<64x128xf32> -> vector<64x128xf32>
    %c0_97 = arith.constant 0 : index
    %c0_98 = arith.constant 0 : index
    %216 = vector.load %arg12[%c0_97, %c0_98] : memref<1x128xf32, #tpu.memory_space<vmem>>, vector<1x128xf32>
    %217 = vector.broadcast %216 : vector<1x128xf32> to vector<64x128xf32>
    %218 = arith.addf %215, %217 : vector<64x128xf32>
    %219 = vector.shape_cast %218 : vector<64x128xf32> to vector<1x64x128xf32>
    %c0_99 = arith.constant 0 : index
    %c0_100 = arith.constant 0 : index
    %c0_101 = arith.constant 0 : index
    %220 = vector.load %arg13[%c0_99, %c0_100, %c0_101] : memref<1x64x128xf32, #tpu.memory_space<vmem>>, vector<1x64x128xf32>
    tpu.vector_store %arg13[%c0_99, %c0_100, %c0_101], %219 {strides = array<i32>} : memref<1x64x128xf32, #tpu.memory_space<vmem>>, vector<1x64x128xf32>,
    return
  }
  func.func @transform_0(%arg0: i32) -> (i32, i32, i32) {
    %c0_i32 = arith.constant 0 : i32
    %c0_i32_0 = arith.constant 0 : i32
    %c0_i32_1 = arith.constant 0 : i32
    return %arg0, %c0_i32, %c0_i32_0 : i32, i32, i32
  }
  func.func @transform_1(%arg0: i32) -> (i32, i32, i32) {
    %c0_i32 = arith.constant 0 : i32
    %c0_i32_0 = arith.constant 0 : i32
    %c0_i32_1 = arith.constant 0 : i32
    return %arg0, %c0_i32, %c0_i32_0 : i32, i32, i32
  }
  func.func @transform_2(%arg0: i32) -> (i32, i32) {
    %c0_i32 = arith.constant 0 : i32
    %c0_i32_0 = arith.constant 0 : i32
    %c0_i32_1 = arith.constant 0 : i32
    return %c0_i32, %c0_i32_0 : i32, i32
  }
  func.func @transform_3(%arg0: i32) -> (i32, i32) {
    %c0_i32 = arith.constant 0 : i32
    %c0_i32_0 = arith.constant 0 : i32
    %c0_i32_1 = arith.constant 0 : i32
    return %c0_i32, %c0_i32_0 : i32, i32
  }
  func.func @transform_4(%arg0: i32) -> (i32, i32) {
    %c0_i32 = arith.constant 0 : i32
    %c0_i32_0 = arith.constant 0 : i32
    %c0_i32_1 = arith.constant 0 : i32
    return %c0_i32, %c0_i32_0 : i32, i32
  }
  func.func @transform_5(%arg0: i32) -> (i32, i32) {
    %c0_i32 = arith.constant 0 : i32
    %c0_i32_0 = arith.constant 0 : i32
    %c0_i32_1 = arith.constant 0 : i32
    return %c0_i32, %c0_i32_0 : i32, i32
  }
  func.func @transform_6(%arg0: i32) -> (i32, i32) {
    %c0_i32 = arith.constant 0 : i32
    %c0_i32_0 = arith.constant 0 : i32
    %c0_i32_1 = arith.constant 0 : i32
    return %c0_i32, %c0_i32_0 : i32, i32
  }
  func.func @transform_7(%arg0: i32) -> (i32, i32) {
    %c0_i32 = arith.constant 0 : i32
    %c0_i32_0 = arith.constant 0 : i32
    %c0_i32_1 = arith.constant 0 : i32
    return %c0_i32, %c0_i32_0 : i32, i32
  }
  func.func @transform_8(%arg0: i32) -> (i32, i32) {
    %c0_i32 = arith.constant 0 : i32
    %c0_i32_0 = arith.constant 0 : i32
    %c0_i32_1 = arith.constant 0 : i32
    return %c0_i32, %c0_i32_0 : i32, i32
  }
  func.func @transform_9(%arg0: i32) -> (i32, i32) {
    %c0_i32 = arith.constant 0 : i32
    %c0_i32_0 = arith.constant 0 : i32
    %c0_i32_1 = arith.constant 0 : i32
    return %c0_i32, %c0_i32_0 : i32, i32
  }
  func.func @transform_10(%arg0: i32) -> (i32, i32) {
    %c0_i32 = arith.constant 0 : i32
    %c0_i32_0 = arith.constant 0 : i32
    %c0_i32_1 = arith.constant 0 : i32
    return %c0_i32, %c0_i32_0 : i32, i32
  }
  func.func @transform_11(%arg0: i32) -> (i32, i32) {
    %c0_i32 = arith.constant 0 : i32
    %c0_i32_0 = arith.constant 0 : i32
    %c0_i32_1 = arith.constant 0 : i32
    return %c0_i32, %c0_i32_0 : i32, i32
  }
  func.func @transform_12(%arg0: i32) -> (i32, i32, i32) {
    %c0_i32 = arith.constant 0 : i32
    %c0_i32_0 = arith.constant 0 : i32
    %c0_i32_1 = arith.constant 0 : i32
    return %arg0, %c0_i32, %c0_i32_0 : i32, i32, i32
  }
}

</mosaic_0001>

<bundles_post_ra>
// kernel: tpu_custom_call.1
= control target key start
LH: loop header
LB: loop body
LE: loop exit
PB: predicated region body
PF: predicated region fallthrough
CT: control target
= control target key end

     0   :  { %s4643_s0 = inlined_call_operand.vmem [shape: f32[2,64,8], index: 0, kind: input, shape index: {}]   ;;  %s4644_s1 = inlined_call_operand.hbm [shape: f32[2,64,128], index: 1, kind: input, shape index: {}]   ;;  %s4645_s2 = inlined_call_operand.vmem [shape: f32[8,16], index: 2, kind: input, shape index: {}]   ;;  %s4646_s3 = inlined_call_operand.vmem [shape: f32[1,16], index: 3, kind: input, shape index: {}]   ;;  %s4647_s4 = inlined_call_operand.vmem [shape: f32[112,32], index: 4, kind: input, shape index: {}]   ;;  %s4648_s5 = inlined_call_operand.vmem [shape: f32[1,32], index: 5, kind: input, shape index: {}]   ;;  %s4649_s6 = inlined_call_operand.vmem [shape: f32[224,128], index: 6, kind: input, shape index: {}]   ;;  %s4650_s7 = inlined_call_operand.vmem [shape: f32[1,128], index: 7, kind: input, shape index: {}]   ;;  %s4651_s8 = inlined_call_operand.hbm [shape: f32[128,128], index: 8, kind: input, shape index: {}]   ;;  %s4652_s9 = inlined_call_operand.vmem [shape: f32[1,128], index: 9, kind: input, shape index: {}]   ;;  %s4653_s10 = inlined_call_operand.hbm [shape: f32[128,128], index: 10, kind: input, shape index: {}]   ;;  %s4654_s11 = inlined_call_operand.vmem [shape: f32[1,128], index: 11, kind: input, shape index: {}]   ;;  %s4655_s12 = inlined_call_operand.hbm [shape: f32[2,64,128], index: 12, kind: output, shape index: {}]  }
   0x1   :  { %4676 = sst [smem:[#allocation16_spill]] %s4654_s11 }
   0x2   :  { %4677 = sst [smem:[#allocation17_spill]] %s4655_s12 }
   0x3   :  { %17 = vsyncpa [#allocation5], 0 }
   0x4   :  { %19 = vsyncpa [#allocation5 + $0x1], 0 }
   0x5   :  { %20 = vsyncpa [#allocation8], 0 }
   0x6   :  { %21 = vsyncpa [#allocation6], 0 }
   0x7   :  { %23 = vsyncpa [#allocation6 + $0x1], 0  ;;  %s3338_s21 = smov 0   ;;  %s3340_s22 = smov 0  }
   0x8   :  { %s3342_s23 = smov 0   ;;  %s3344_s24 = smov 0  }
   0x9 LB: > { %4678 = sst [smem:[#allocation14_spill]] %s3243_s21  ;;  %s3359_s25 = sadd.s32 4294967295, %s3255_s24   ;;  %s3255_s24 = sphi %s3344_s24, %s4710_s24   ;;  %s3251_s23 = sphi %s3342_s23, %s4709_s23   ;;  %s3247_s22 = sphi %s3340_s22, %s4708_s22   ;;  %s3243_s21 = sphi %s3338_s21, %s4707_s21  }
   0xa   : > { %s2591_s26 = sadd.s32 4294967294, %s3255_s24   ;;  %p75_p0 = scmp.ne.s32.totalorder %s3247_s22, %s3243_s21 }
   0xb   : > { %p4657_p1 = scmp.eq.s32.totalorder %s3359_s25, 0  ;;  %p315_p3 = scmp.eq.s32.totalorder %s2591_s26, 1 }
   0xc   : > { %p2592_p5 = scmp.ge.s32.totalorder %s3255_s24, 1  ;;  %p322_p7 = scmp.lt.s32.totalorder %s3255_s24, 3 }
   0xd   : > { %p3368_p4 = por %p4657_p1, %p75_p0  ;;  %p3373_p6 = por %p315_p3, %p75_p0 }
   0xe   : > { %p3378_p8 = pnand %p2592_p5, %p322_p7  ;;  %s3257_s30 = smov [#allocation7]  }
   0xf   : > { %s4679_s27 = scalar_select %p3368_p4, 1, 0 }
  0x10   : > { %s4680_s28 = scalar_select %p3373_p6, 1, 0 }
  0x11   : > { %s352_s13 = sshll.u32 %s3257_s30, 4  ;;  %p3032_p9 = pneg %p3378_p8  ;;  %s3382_s13 = int_to_ptr.vmem [resolvable:$true] %s352_s13 }
  0x12   : > { %4681 = sst [smem:[#allocation15_spill]] %s4680_s28  ;;  %s3258_s15 = smov [#allocation9]  }
  0x13   : > { %p3389_p11 = pnand %p3032_p9, %p4657_p1  ;;  %s368_s16 = sshll.u32 %s3258_s15, 4  ;;  %s3393_s16 = int_to_ptr.vmem [resolvable:$true] %s368_s16 }
  0x14   : > { %s3099_s19 = scalar_lea.hbm %s4651_s8, 2048 }
  0x15   : > { %p3100_p12 = scmp.ne.s32.totalorder %s4651_s8, %s3099_s19  ;;  %p3101_p13 = pneg %p3389_p11 }
  0x16   : > { %p3106_p5 = scmp.lt.u32.totalorder %s3099_s19, %s4651_s8 }
  0x17   : > { %p3102_p0 = pnand %p3101_p13, %p3100_p12 }
  0x19   : > { %p3103_p3 = pneg %p3102_p0 }
  0x1b   : > { %p3108_p7 = pnand %p3106_p5, %p3103_p3 }
  0x1d   : > { %3111 = shalt.err (!%p3108_p7)
}
  0x1e   : > { %s3112_s15 = scalar_lea.vmem %s3382_s13, 2048  ;;  %p3120_p2 = scmp.lt.s32.totalorder %s3382_s13, %s3382_s13 }
  0x1f   : > { %p3113_p9 = scmp.ne.s32.totalorder %s3382_s13, %s3112_s15  ;;  %p3121_p12 = scmp.lt.s32.totalorder %s3112_s15, %s3112_s15 }
  0x21   : > { %p3115_p10 = pnand %p3113_p9, %p3101_p13  ;;  %p3122_p0 = por %p3121_p12, %p3120_p2 }
  0x23   : > { %p3116_p1 = pneg %p3115_p10 }
  0x25   : > { %p3123_p6 = pnand %p3122_p0, %p3116_p1 }
  0x27   : > { %3126 = shalt.err (!%p3123_p6)
}
  0x28   : > { %s4660_s28 = smov 128   ;;  %s4661_s17 = smov 8  }
  0x29   : > { %3035 = dma.hbm_to_vmem [thread:$0]  (!%p3389_p11), %s4651_s8, 2048, %s3382_s13, [#allocation8], %s4660_s28, %s4660_s28, %s4661_s17  }
  0x2a   : > { %s3127_s30 = scalar_lea.hbm %s4653_s10, 2048 }
  0x2b   : > { %p3128_p1 = scmp.ne.s32.totalorder %s4653_s10, %s3127_s30  ;;  %p3134_p10 = scmp.lt.u32.totalorder %s3127_s30, %s4653_s10 }
  0x2d   : > { %p3130_p2 = pnand %p3128_p1, %p3101_p13 }
  0x2f   : > { %p3131_p6 = pneg %p3130_p2 }
  0x31   : > { %p3136_p3 = pnand %p3134_p10, %p3131_p6 }
  0x33   : > { %3139 = shalt.err (!%p3136_p3)
}
  0x34   : > { %s3140_s13 = scalar_lea.vmem %s3393_s16, 2048  ;;  %p3148_p12 = scmp.lt.s32.totalorder %s3393_s16, %s3393_s16 }
  0x35   : > { %p3141_p5 = scmp.ne.s32.totalorder %s3393_s16, %s3140_s13  ;;  %p3149_p0 = scmp.lt.s32.totalorder %s3140_s13, %s3140_s13 }
  0x37   : > { %p3143_p7 = pnand %p3141_p5, %p3101_p13  ;;  %p3150_p1 = por %p3149_p0, %p3148_p12 }
  0x39   : > { %p3144_p9 = pneg %p3143_p7 }
  0x3b   : > { %p3151_p2 = pnand %p3150_p1, %p3144_p9 }
  0x3d   : > { %3154 = shalt.err (!%p3151_p2)
}
  0x3e   : > { %3038 = dma.hbm_to_vmem [thread:$0]  (!%p3389_p11), %s4653_s10, 2048, %s3393_s16, [#allocation8], %s4660_s28, %s4660_s28, %s4661_s17  }
  0x3f   : > { %s3454_s21 = sadd.s32 1, %s3255_s24   ;;  %s62_s14 = sadd.s32 1, %s3251_s23 }
  0x40   : > { %s59_s18 = ssub.s32 %s3255_s24, %s3454_s21  ;;  %p69_p13 = scmp.ne.s32.totalorder %s3251_s23, %s3247_s22 }
  0x41   : > { %p60_p6 = scmp.eq.s32.totalorder %s59_s18, 0  ;;  %p70_p10 = scmp.eq.s32.totalorder %s3255_s24, 0 }
  0x42   : > { %p4684_p3 = scmp.eq.s32.totalorder %s3359_s25, 1  ;;  %p3049_p7 = scmp.lt.s32.totalorder %s3255_s24, 2 }
  0x43   : > { %s3470_s20 = scalar_select %p60_p6, %s3251_s23, %s62_s14  }
  0x44   : > { %p3464_p5 = por %p4684_p3, %p69_p13  ;;  %p71_p9 = por %p70_p10, %p69_p13 }
  0x45   : > { %s393_s26 = sand.u32 1, %s3251_s23   ;;  %s2646_s16 = sshll.u32 %s3255_s24, 10 }
  0x46   : > { %s4685_s19 = scalar_select %p3464_p5, 1, 0 }
  0x47   : > { %s2596_s30 = sshll.u32 %s393_s26, 6  ;;  %s3477_s11 = scalar_lea.hbm %s4644_s1, %s2646_s16 }
  0x48   : > { %s397_s12 = scalar_lea.vmem [#allocation4], %s2596_s30  ;;  %p3481_p11 = pnand %p3049_p7, %p71_p9 }
  0x49   : > { %s404_s18 = sshll.u32 %s397_s12, 4  ;;  %s3485_s28 = scalar_lea.sflag [#allocation5], %s393_s26  ;;  %s3479_s18 = int_to_ptr.vmem [resolvable:$true] %s404_s18 }
  0x4a   : > { %s3155_s17 = scalar_lea.hbm %s3477_s11, 1024  ;;  %p3157_p0 = pneg %p3481_p11 }
  0x4b   : > { %p3156_p12 = scmp.ne.s32.totalorder %s3477_s11, %s3155_s17  ;;  %s3160_s15 = scalar_lea.hbm %s4644_s1, 2048 }
  0x4c   : > { %p3161_p13 = scmp.lt.u32.totalorder %s3477_s11, %s4644_s1  ;;  %p3162_p6 = scmp.lt.u32.totalorder %s3160_s15, %s3155_s17 }
  0x4d   : > { %p3158_p1 = pnand %p3157_p0, %p3156_p12  ;;  %p3164_p3 = scmp.lt.u32.totalorder %s3155_s17, %s3477_s11 }
  0x4e   : > { %p3163_p10 = por %p3162_p6, %p3161_p13 }
  0x4f   : > { %p3159_p2 = pneg %p3158_p1 }
  0x50   : > { %p3165_p7 = por %p3164_p3, %p3163_p10 }
  0x52   : > { %p3166_p9 = pnand %p3165_p7, %p3159_p2 }
  0x54   : > { %3169 = shalt.err (!%p3166_p9)
}
  0x55   : > { %s3170_s26 = scalar_lea.vmem %s3479_s18, 1024  ;;  %s3261_s30 = smov [#allocation4]  }
  0x56   : > { %p3171_p12 = scmp.ne.s32.totalorder %s3479_s18, %s3170_s26  ;;  %s3175_s16 = sshll.u32 %s3261_s30, 4  ;;  %s3176_s16 = int_to_ptr.vmem [resolvable:$false] %s3175_s16 }
  0x57   : > { %s3177_s13 = scalar_lea.vmem %s3176_s16, 2048  ;;  %p3178_p4 = scmp.lt.s32.totalorder %s3479_s18, %s3176_s16 }
  0x58   : > { %p3173_p1 = pnand %p3171_p12, %p3157_p0  ;;  %p3179_p13 = scmp.lt.s32.totalorder %s3177_s13, %s3170_s26 }
  0x5a   : > { %p3174_p5 = pneg %p3173_p1  ;;  %p3180_p6 = por %p3179_p13, %p3178_p4 }
  0x5c   : > { %p3181_p10 = pnand %p3180_p6, %p3174_p5 }
  0x5e   : > { %3184 = shalt.err (!%p3181_p10)
}
  0x5f   : > { %s4687_s17 = smov 8   ;;  %s4688_s15 = smov 128  }
  0x60   : > { %3042 = dma.hbm_to_vmem [thread:$0]  (!%p3481_p11), %s3477_s11, 1024, %s3479_s18, %s3485_s28, %s4688_s15, %s4688_s15, %s4687_s17  }
  0x61   : > { %416 = sbr.rel (%p3378_p8) target bundleno = 1627 (0x65b), region = 68  ;;  %s3519_s12 = sand.u32 (!%p3378_p8), 1, %s3247_s22  }
  0x62   : > { %s4664_s26 = sshll.u32 (!%p3378_p8), %s3519_s12, 6  ;;  %s419_s30 = scalar_lea.sflag (!%p3378_p8), [#allocation5], %s3519_s12 }
  0x63   : > { %s3525_s14 = scalar_lea.vmem (!%p3378_p8), [#allocation4], %s4664_s26  ;;  %p4689_p4 = scmp.ne.s32.totalorder (!%p3378_p8), %s4679_s27, 0 }
  0x68   : > { %3230 = dma.done.wait (%p4689_p4), %s419_s30, 1024  }
  0x69   : > { %3232 = vsyncadd (%p4689_p4), %s419_s30, 4294966272  ;;  %p4690_p5 = scmp.eq.s32.totalorder %s3359_s25, 0 }
  0x6b   : > { %3234 = dma.done.wait (%p4690_p5), [#allocation8], 4096   ;;  %p4691_p8 = pmov %p4690_p5 }
  0x6c   : > { %p476_p11 = scmp.lt.s32.totalorder %s3359_s25, 1  ;;  %vm610_vm0 = vcmask 64512   ;;  %v602_v0 = vld [vmem:[%s4645_s2] sm:$0xff]  ;;  %v481_v9 = vlaneseq  ;;  %s4667_s30 = smov 48   ;;  %vm829_vm7 = vcmask 130048   ;;  %vm943_vm14 = vcmask 261248  }
  0x6d   : > { %3236 = vsyncadd (%p4691_p8), [#allocation8], 4294963200  ;;  %2728 = vmatprep.subr.mxu1 %v602_v0  ;;  %v3554_v10 = vld [vmem:[%s4646_s3] ss:$0 sm:$0xff]  ;;  %s4671_s11 = smov 80   ;;  %s4665_s18 = smov 64  }
  0x6e   : > { %s477_s29 = scalar_select %p476_p11, %s3359_s25, 1  ;;  %2729 = vmatpush3.msra.mxu1 %v602_v0  ;;  %v3556_v12 = vshrl.u32 %v481_v9, 7  ;;  %vm1057_vm15 = vcmask 392448  }
  0x6f   : > { %s4693_s17 = smov 64   ;;  %s4697_s15 = smov 48  }
  0x70   : > { %s2647_s28 = sshll.u32 %s477_s29, 6  ;;  %vm960_vm1 = vcmp.lt.s32.totalorder %v3556_v12, 1  ;;  %vm846_vm2 = vcmp.lt.s32.totalorder %v3556_v12, 2  ;;  %vm1229_vm3 = vcmp.lt.s32.totalorder %v3556_v12, 6  ;;  %vm1115_vm4 = vcmp.lt.s32.totalorder %v3556_v12, 7  ;;  %s4673_s29 = smov 32  }
  0x71   : > { %s480_s16 = scalar_lea.vmem %s4643_s0, %s2647_s28  ;;  %vm1343_vm5 = vcmp.lt.s32.totalorder %v3556_v12, 5  ;;  %v3572_v24 = vand.u32 63, %v3556_v12  ;;  %s4675_s28 = smov 16   ;;  %vm764_vm6 = vcmp.lt.s32.totalorder %v3556_v12, 3 }
  0x72   : > { %v586_v1 = vld [vmem:[%s480_s16] sm:$0xff]  ;;  %v587_v2 = vld [vmem:[%s480_s16 + $0x8] sm:$0xff]  ;;  %v588_v3 = vld [vmem:[%s480_s16 + $0x10] sm:$0xff]  ;;  %s2648_s13 = sshll.u32 %s3359_s25, 10  ;;  %p4701_p2 = scmp.ne.s32.totalorder %s4685_s19, 0 }
  0x73   : > { %2730 = vmatprep.mubr.msk.f32.mxu1 %vm610_vm0, %v586_v1  ;;  %v589_v4 = vld [vmem:[%s480_s16 + $0x18] sm:$0xff]  ;;  %v590_v5 = vld [vmem:[%s480_s16 + $0x20] sm:$0xff]  ;;  %v591_v6 = vld [vmem:[%s480_s16 + $0x28] sm:$0xff]  ;;  %s3270_s25 = smov [#allocation10]  }
  0x74   : > { %2731 = vmatmul.mubr.msk.f32.vlgmr.msra.gmra.mrb[0].mxu1 %vm610_vm0, %v587_v2  ;;  %v592_v7 = vld [vmem:[%s480_s16 + $0x30] sm:$0xff]  ;;  %v593_v8 = vld [vmem:[%s480_s16 + $0x38] sm:$0xff]  ;;  %s4669_s16 = smov 96  }
  0x75   : > { %2733 = vmatprep.mubr.msk.f32.mxu1 %vm610_vm0, %v588_v3 }
  0x78   : > { %2734 = vmatmul.mubr.msk.f32.gmra.mrb[2].mxu1 %vm610_vm0, %v589_v4 }
  0x79   : > { %2736 = vmatprep.mubr.msk.f32.mxu1 %vm610_vm0, %v590_v5 }
  0x7c   : > { %2737 = vmatmul.mubr.msk.f32.gmra.mrb[4].mxu1 %vm610_vm0, %v591_v6 }
  0x7d   : > { %2739 = vmatprep.mubr.msk.f32.mxu1 %vm610_vm0, %v592_v7 }
  0x80   : > { %2740 = vmatmul.mubr.msk.f32.gmra.mrb[6].mxu1 %vm610_vm0, %v593_v8  ;;  %vm1098_vm0 = vcmask 523648  }
 0x147   : > { %v2732_v11 = vpop.f32.mrb[0].mxu1 }
 0x148   : > { %v707_v13 = vadd.f32 %v2732_v11, %v3554_v10  ;;  %v701_v14 = vpop.f32.mrb[1].mxu1 }
 0x149   : > { %v702_v15 = vadd.f32 %v3554_v10, %v701_v14 }
 0x14a   : > { %v741_v16 = vmul.f32 0.2, %v707_v13 }
 0x14b   : > { %v740_v17 = vmul.f32 0.2, %v702_v15  ;;  %v2735_v18 = vpop.f32.mrb[2].mxu1 }
 0x14c   : > { %v3562_v19 = vmax.f32 %v707_v13, %v741_v16  ;;  %v717_v20 = vadd.f32 %v2735_v18, %v3554_v10  ;;  %v711_v21 = vpop.f32.mrb[3].mxu1 }
 0x14d   : > { %v3567_v22 = vmax.f32 %v702_v15, %v740_v17  ;;  %v712_v23 = vadd.f32 %v3554_v10, %v711_v21 }
 0x14e   : > { %v743_v25 = vmul.f32 0.2, %v717_v20  ;;  %1076 = vrot.lane.b32.xlu1 %v3562_v19, %s4667_s30  ;;  %v953_v26 = vrot.slane %v3562_v19, 7  ;;  %v839_v27 = vrot.slane %v3562_v19, 6  ;;  %v1222_v28 = vrot.slane %v3562_v19, 2 }
 0x14f   : > { %v742_v29 = vmul.f32 0.2, %v712_v23  ;;  %v2738_v30 = vpop.f32.mrb[4].mxu1  ;;  %1074 = vrot.lane.b32.xlu0 %v3567_v22, %s4667_s30  ;;  %v952_v31 = vrot.slane %v3567_v22, 7  ;;  %v838_v32 = vrot.slane %v3567_v22, 6  ;;  %v1221_v33 = vrot.slane %v3567_v22, 2 }
 0x150   : > { %v3584_v34 = vmax.f32 %v717_v20, %v743_v25  ;;  %v727_v35 = vadd.f32 %v2738_v30, %v3554_v10  ;;  %v721_v36 = vpop.f32.mrb[5].mxu1  ;;  %v1107_v37 = vrot.slane %v3567_v22, 1  ;;  %v1108_v38 = vrot.slane %v3562_v19, 1 }
 0x151   : > { %v3589_v39 = vmax.f32 %v712_v23, %v742_v29  ;;  %v722_v40 = vadd.f32 %v3554_v10, %v721_v36  ;;  %v967_v41 = vsel %vm960_vm1, %v952_v31, %v953_v26  ;;  %v853_v42 = vsel %vm846_vm2, %v838_v32, %v839_v27 }
 0x152   : > { %v745_v43 = vmul.f32 0.2, %v727_v35  ;;  %1035 = vrot.lane.b32.xlu1 %v967_v41, %s4673_s29  ;;  %v1236_v44 = vsel %vm1229_vm3, %v1221_v33, %v1222_v28  ;;  %v1122_v45 = vsel %vm1115_vm4, %v1107_v37, %v1108_v38  ;;  %v1335_v46 = vrot.slane %v3567_v22, 3 }
 0x153   : > { %v744_v47 = vmul.f32 0.2, %v722_v40  ;;  %v2741_v48 = vpop.f32.mrb[6].mxu1  ;;  %921 = vrot.lane.b32.xlu0 %v853_v42, %s4675_s28  ;;  %v1336_v49 = vrot.slane %v3562_v19, 3  ;;  %v1109_v50 = vrot.slane %v3589_v39, 1  ;;  %v840_v51 = vrot.slane %v3589_v39, 6 }
 0x154   : > { %v3614_v52 = vmax.f32 %v727_v35, %v745_v43  ;;  %v737_v53 = vadd.f32 %v2741_v48, %v3554_v10  ;;  %v841_v54 = vrot.slane %v3584_v34, 6  ;;  %v1223_v55 = vrot.slane %v3589_v39, 2  ;;  %v731_v56 = vpop.f32.mrb[7].mxu1 }
 0x155   : > { %v3619_v57 = vmax.f32 %v722_v40, %v744_v47  ;;  %v1350_v58 = vsel %vm1343_vm5, %v1335_v46, %v1336_v49  ;;  %v1121_v59 = vsel %vm1115_vm4, %v1108_v38, %v1109_v50  ;;  %v732_v60 = vadd.f32 %v3554_v10, %v731_v56 }
 0x156   : > { %v747_v61 = vmul.f32 0.2, %v737_v53  ;;  %1302 = vrot.lane.b32.xlu1 %v1236_v44, %s4671_s11  ;;  %v851_v62 = vsel %vm846_vm2, %v840_v51, %v841_v54  ;;  %v1235_v63 = vsel %vm1229_vm3, %v1222_v28, %v1223_v55  ;;  %v3635_v0 = vsel %vm846_vm2, %v839_v27, %v840_v51 }
 0x157   : > { %1188 = vrot.lane.b32.xlu0 %v1122_v45, %s4665_s18  ;;  %v746_v1 = vmul.f32 0.2, %v732_v60  ;;  %v954_v2 = vrot.slane %v3589_v39, 7  ;;  %v955_v3 = vrot.slane %v3584_v34, 7  ;;  %v1337_v4 = vrot.slane %v3589_v39, 3 }
 0x158   : > { %v3641_v5 = vmax.f32 %v737_v53, %v747_v61  ;;  %v1224_v6 = vrot.slane %v3584_v34, 2  ;;  %v1110_v7 = vrot.slane %v3584_v34, 1  ;;  %v1338_v8 = vrot.slane %v3584_v34, 3 }
 0x159   : > { %v3646_v9 = vmax.f32 %v732_v60, %v746_v1  ;;  %v3650_v10 = vsel %vm960_vm1, %v954_v2, %v955_v3  ;;  %v3654_v11 = vsel %vm960_vm1, %v953_v26, %v954_v2  ;;  %v3658_v13 = vsel %vm1343_vm5, %v1336_v49, %v1337_v4 }
 0x15a   : > { %1416 = vrot.lane.b32.xlu1 %v1350_v58, %s4669_s16  ;;  %v3663_v14 = vsel %vm1229_vm3, %v1223_v55, %v1224_v6  ;;  %v3667_v15 = vsel %vm1115_vm4, %v1109_v50, %v1110_v7  ;;  %v3671_v16 = vsel %vm1343_vm5, %v1337_v4, %v1338_v8  ;;  %v1111_v17 = vrot.slane %v3619_v57, 1 }
 0x15b   : > { %1190 = vrot.lane.b32.xlu0 %v1121_v59, %s4665_s18  ;;  %v842_v18 = vrot.slane %v3619_v57, 6  ;;  %v843_v20 = vrot.slane %v3614_v52, 6  ;;  %v1225_v21 = vrot.slane %v3619_v57, 2  ;;  %v956_v23 = vrot.slane %v3619_v57, 7 }
 0x15c   : > { %v3681_v25 = vsel %vm1115_vm4, %v1110_v7, %v1111_v17  ;;  %v957_v26 = vrot.slane %v3614_v52, 7  ;;  %v1339_v27 = vrot.slane %v3619_v57, 3  ;;  %v1226_v28 = vrot.slane %v3614_v52, 2 }
 0x15d   : > { %v3688_v29 = vsel %vm846_vm2, %v842_v18, %v843_v20  ;;  %v3692_v30 = vsel %vm1229_vm3, %v1224_v6, %v1225_v21  ;;  %v3696_v35 = vsel %vm846_vm2, %v841_v54, %v842_v18  ;;  %v3700_v36 = vsel %vm960_vm1, %v955_v3, %v956_v23 }
 0x15e   : > { %1080 = vrot.lane.b32.xlu1 %v3584_v34, %s4667_s30  ;;  %v3707_v38 = vsel %vm960_vm1, %v956_v23, %v957_v26  ;;  %v3711_v40 = vsel %vm1343_vm5, %v1338_v8, %v1339_v27  ;;  %v3715_v41 = vsel %vm1229_vm3, %v1225_v21, %v1226_v28  ;;  %v1112_v42 = vrot.slane %v3614_v52, 1 }
 0x15f   : > { %925 = vrot.lane.b32.xlu0 %v851_v62, %s4675_s28  ;;  %v1340_v43 = vrot.slane %v3614_v52, 3  ;;  %v1113_v44 = vrot.slane %v3646_v9, 1  ;;  %v844_v45 = vrot.slane %v3646_v9, 6  ;;  %v845_v47 = vrot.slane %v3641_v5, 6 }
 0x160   : > { %v3725_v48 = vsel %vm1115_vm4, %v1111_v17, %v1112_v42  ;;  %v958_v49 = vrot.slane %v3646_v9, 7  ;;  %v1227_v50 = vrot.slane %v3646_v9, 2  ;;  %v959_v51 = vrot.slane %v3641_v5, 7 }
 0x161   : > { %v3732_v53 = vsel %vm1343_vm5, %v1339_v27, %v1340_v43  ;;  %v3736_v54 = vsel %vm1115_vm4, %v1112_v42, %v1113_v44  ;;  %v3740_v55 = vsel %vm846_vm2, %v843_v20, %v844_v45  ;;  %v3744_v56 = vsel %vm846_vm2, %v844_v45, %v845_v47 }
 0x162   : > { %1078 = vrot.lane.b32.xlu1 %v3589_v39, %s4667_s30  ;;  %v3750_v58 = vsel %vm960_vm1, %v957_v26, %v958_v49  ;;  %v3754_v59 = vsel %vm1229_vm3, %v1226_v28, %v1227_v50  ;;  %v3760_v60 = vsel %vm960_vm1, %v959_v51, %v952_v31  ;;  %v3766_v61 = vsel %vm846_vm2, %v845_v47, %v838_v32  ;;  %v1465_v47 = vld [vmem:[%s4647_s4 + $0x40] sm:$0xff] }
 0x163   : > { %1304 = vrot.lane.b32.xlu0 %v1235_v63, %s4671_s11  ;;  %v3771_v62 = vsel %vm960_vm1, %v958_v49, %v959_v51  ;;  %v1341_v1 = vrot.slane %v3646_v9, 3  ;;  %v773_v2 = vadd.s32 4294967293, %v3572_v24  ;;  %v1114_v31 = vrot.slane %v3641_v5, 1 }
 0x164   : > { %v1228_v3 = vrot.slane %v3641_v5, 2  ;;  %v1342_v4 = vrot.slane %v3641_v5, 3  ;;  %v757_v32 = vrot.slane %v3562_v19, 5  ;;  %v756_v6 = vrot.slane %v3567_v22, 5 }
 0x165   : > { %v3781_v63 = vsel %vm1343_vm5, %v1340_v43, %v1341_v1  ;;  %v758_v7 = vrot.slane %v3589_v39, 5  ;;  %v759_v8 = vrot.slane %v3584_v34, 5  ;;  %v3792_v17 = vsel %vm1115_vm4, %v1114_v31, %v1107_v37 }
 0x166   : > { %923 = vrot.lane.b32.xlu1 %v3635_v0, %s4675_s28  ;;  %v3796_v19 = vsel %vm1115_vm4, %v1113_v44, %v1114_v31  ;;  %v3802_v39 = vsel %vm1229_vm3, %v1228_v3, %v1221_v33  ;;  %v3806_v34 = vsel %vm1229_vm3, %v1227_v50, %v1228_v3  ;;  %v3814_v37 = vsel %vm1343_vm5, %v1342_v4, %v1335_v46  ;;  %v1468_v50 = vld [vmem:[%s4647_s4 + $0x58] sm:$0xff] }
 0x167   : > { %1039 = vrot.lane.b32.xlu0 %v3650_v10, %s4673_s29  ;;  %v3818_v0 = vsel %vm1343_vm5, %v1341_v1, %v1342_v4  ;;  %vm781_vm8 = vcmp.ge.s32.totalorder %v773_v2, 0  ;;  %v771_v33 = vsel %vm764_vm6, %v756_v6, %v757_v32  ;;  %v769_v18 = vsel %vm764_vm6, %v758_v7, %v759_v8  ;;  %v1470_v1 = vld [vmem:[%s4647_s4 + $0x68] sm:$0xff] }
 0x168   : > { %831 = vst.msk [vmem:[#allocation2 + $0x8] sm:$0xff] %vm829_vm7, %v771_v33  ;;  %833 = vst.msk [vmem:[#allocation2 + $0x18] sm:$0xff] %vm829_vm7, %v769_v18  ;;  %v770_v22 = vsel %vm764_vm6, %v757_v32, %v758_v7  ;;  %v760_v46 = vrot.slane %v3619_v57, 5  ;;  %v761_v10 = vrot.slane %v3614_v52, 5  ;;  %v762_v20 = vrot.slane %v3646_v9, 5 }
 0x169   : > { %832 = vst.msk [vmem:[#allocation2 + $0x10] sm:$0xff] %vm829_vm7, %v770_v22  ;;  %v763_v21 = vrot.slane %v3641_v5, 5  ;;  %v3268_v23 = vmov 0.0   ;;  %v489_v45 = vadd.s32 56, %v3556_v12  ;;  %v2018_v12 = vld [vmem:[%s4649_s6 + $0x70] sm:$0xff] }
 0x16a   : > { %1037 = vrot.lane.b32.xlu1 %v3654_v11, %s4673_s29  ;;  %v3836_v26 = vsel %vm781_vm8, 1.0, %v3268_v23  ;;  %v767_v27 = vsel %vm764_vm6, %v760_v46, %v761_v10  ;;  %v768_v28 = vsel %vm764_vm6, %v759_v8, %v760_v46  ;;  %v766_v11 = vsel %vm764_vm6, %v761_v10, %v762_v20 }
 0x16b   : > { %1418 = vrot.lane.b32.xlu0 %v3658_v13, %s4669_s16  ;;  %835 = vst.msk [vmem:[#allocation2 + $0x28] sm:$0xff] %vm829_vm7, %v767_v27  ;;  %834 = vst.msk [vmem:[#allocation2 + $0x20] sm:$0xff] %vm829_vm7, %v768_v28  ;;  %v765_v42 = vsel %vm764_vm6, %v762_v20, %v763_v21  ;;  %v772_v43 = vsel %vm764_vm6, %v763_v21, %v756_v6  ;;  %vm1326_vm8 = vcmask 786048  }
 0x16c   : > { %836 = vst.msk [vmem:[#allocation2 + $0x30] sm:$0xff] %vm829_vm7, %v766_v11  ;;  %837 = vst.msk [vmem:[#allocation2 + $0x38] sm:$0xff] %vm829_vm7, %v765_v42  ;;  %v821_v13 = vmul.f32 %v3836_v26, %v772_v43 }
 0x16e   : > { %1306 = vrot.lane.b32.xlu1 %v3663_v14, %s4671_s11  ;;  %830 = vst.msk [vmem:[#allocation2] sm:$0xff] %vm829_vm7, %v821_v13  ;;  %v1457_v14 = vld [vmem:[%s4647_s4] sm:$0xff]  ;;  %vm1212_vm7 = vcmask 654848  }
 0x16f   : > { %1192 = vrot.lane.b32.xlu0 %v3667_v15, %s4665_s18  ;;  %v1458_v15 = vld [vmem:[%s4647_s4 + $0x8] sm:$0xff] }
 0x172   : > { %1420 = vrot.lane.b32.xlu1 %v3671_v16, %s4669_s16  ;;  %v2870_v16 = vpack.c.bf16 %v1458_v15, %v1457_v14  ;;  %s4698_s16 = sld [smem:[#allocation16_spill]] }
 0x173   : > { %1194 = vrot.lane.b32.xlu0 %v3681_v25, %s4665_s18  ;;  %s4692_s18 = smov 96  }
 0x174   : > { %2871 = vmatprep.subr.bf16.mxu1 %v2870_v16 }
 0x175   : > { %2873 = vmatpush3.bf16.msra.mxu1 %v2870_v16 }
 0x176   : > { %1084 = vrot.lane.b32.xlu1 %v3614_v52, %s4667_s30  ;;  %v1459_v52 = vld [vmem:[%s4647_s4 + $0x10] sm:$0xff] }
 0x177   : > { %929 = vrot.lane.b32.xlu0 %v3688_v29, %s4675_s28  ;;  %v1461_v29 = vld [vmem:[%s4647_s4 + $0x20] sm:$0xff] }
 0x17a   : > { %1082 = vrot.lane.b32.xlu1 %v3619_v57, %s4667_s30  ;;  %v1460_v57 = vld [vmem:[%s4647_s4 + $0x18] sm:$0xff]  ;;  %s3189_s30 = sshll.u32 %s3270_s25, 4  ;;  %s3190_s30 = int_to_ptr.vmem [resolvable:$false] %s3189_s30 }
 0x17b   : > { %1308 = vrot.lane.b32.xlu0 %v3692_v30, %s4671_s11  ;;  %v2874_v25 = vpack.c.bf16 %v1460_v57, %v1459_v52  ;;  %v1462_v30 = vld [vmem:[%s4647_s4 + $0x28] sm:$0xff] }
 0x17d   : > { %2875 = vmatprep.subr.bf16.mxu1 %v2874_v25 }
 0x17e   : > { %927 = vrot.lane.b32.xlu1 %v3696_v35, %s4675_s28  ;;  %2877 = vmatpush3.bf16.msra.mxu1 %v2874_v25  ;;  %v2878_v35 = vpack.c.bf16 %v1462_v30, %v1461_v29 }
 0x17f   : > { %1043 = vrot.lane.b32.xlu0 %v3707_v38, %s4673_s29  ;;  %v1464_v38 = vld [vmem:[%s4647_s4 + $0x38] sm:$0xff] }
 0x180   : > { %2879 = vmatprep.subr.bf16.mxu1 %v2878_v35 }
 0x182   : > { %1041 = vrot.lane.b32.xlu1 %v3700_v36, %s4673_s29  ;;  %v1463_v36 = vld [vmem:[%s4647_s4 + $0x30] sm:$0xff]  ;;  %2881 = vmatpush3.bf16.msra.mxu1 %v2878_v35  ;;  %s4695_s29 = smov 80  }
 0x183   : > { %1422 = vrot.lane.b32.xlu0 %v3711_v40, %s4692_s18  ;;  %v2882_v44 = vpack.c.bf16 %v1464_v38, %v1463_v36  ;;  %v969_v40 = vadd.s32 4294967295, %v3572_v24 }
 0x185   : > { %2883 = vmatprep.subr.bf16.mxu1 %v2882_v44  ;;  %vm977_vm9 = vcmp.ge.s32.totalorder %v969_v40, 0 }
 0x186   : > { %1310 = vrot.lane.b32.xlu1 %v3715_v41, %s4671_s11  ;;  %v855_v41 = vadd.s32 4294967294, %v3572_v24  ;;  %2885 = vmatpush3.bf16.msra.mxu1 %v2882_v44  ;;  %v1467_v24 = vld [vmem:[%s4647_s4 + $0x50] sm:$0xff]  ;;  %v3932_v51 = vsel %vm977_vm9, 1.0, %v3268_v23  ;;  %s4696_s11 = smov 16   ;;  %vm1440_vm9 = vcmask 917248  }
 0x187   : > { %1196 = vrot.lane.b32.xlu0 %v3725_v48, %s4693_s17  ;;  %v1466_v48 = vld [vmem:[%s4647_s4 + $0x48] sm:$0xff] }
 0x188   : > { %vm863_vm10 = vcmp.ge.s32.totalorder %v855_v41, 0  ;;  %v2886_v49 = vpack.c.bf16 %v1466_v48, %v1465_v47 }
 0x18a   : > { %1424 = vrot.lane.b32.xlu1 %v3732_v53, %s4692_s18  ;;  %v2890_v53 = vpack.c.bf16 %v1468_v50, %v1467_v24  ;;  %2887 = vmatprep.subr.bf16.mxu1 %v2886_v49 }
 0x18b   : > { %1198 = vrot.lane.b32.xlu0 %v3736_v54, %s4693_s17  ;;  %v3937_v54 = vsel %vm863_vm10, 1.0, %v3268_v23  ;;  %2889 = vmatpush3.bf16.msra.mxu1 %v2886_v49  ;;  %vm1478_vm10 = vcmask 916480  }
 0x18c   : > { %2891 = vmatprep.subr.bf16.mxu1 %v2890_v53  ;;  %v903_v31 = vmul.f32 %v3937_v54, %v3766_v61 }
 0x18e   : > { %931 = vrot.lane.b32.xlu1 %v3740_v55, %s4675_s28  ;;  %v543_v55 = vand.u32 63, %v489_v45 }
 0x18f   : > { %933 = vrot.lane.b32.xlu0 %v3744_v56, %s4675_s28  ;;  %s4694_s28 = smov 32   ;;  %v1469_v56 = vld [vmem:[%s4647_s4 + $0x60] sm:$0xff]  ;;  %2893 = vmatpush3.bf16.msra.mxu1 %v2890_v53 }
 0x190   : > { %v2894_v2 = vpack.c.bf16 %v1470_v1, %v1469_v56  ;;  %v1131_v3 = vadd.s32 1, %v543_v55  ;;  %v1359_v61 = vadd.s32 3, %v543_v55 }
 0x192   : > { %1045 = vrot.lane.b32.xlu1 %v3750_v58, %s4694_s28  ;;  %v1017_v58 = vmul.f32 %v3932_v51, %v3760_v60  ;;  %2895 = vmatprep.subr.bf16.mxu1 %v2894_v2  ;;  %vm1147_vm11 = vcmp.lt.s32.totalorder %v1131_v3, 64  ;;  %vm1375_vm13 = vcmp.lt.s32.totalorder %v1359_v61, 64 }
 0x193   : > { %1312 = vrot.lane.b32.xlu0 %v3754_v59, %s4695_s29  ;;  %v1245_v59 = vadd.s32 2, %v543_v55  ;;  %2897 = vmatpush3.bf16.msra.mxu1 %v2894_v2  ;;  %v3958_v60 = vsel %vm1147_vm11, 1.0, %v3268_v23  ;;  %vm1648_vm11 = vcmask 261120  }
 0x195   : > { %vm1261_vm12 = vcmp.lt.s32.totalorder %v1245_v59, 64 }
 0x196   : > { %1033 = vrot.lane.b32.xlu1 %v1017_v58, %s4694_s28  ;;  %v3967_v4 = vsel %vm1261_vm12, 1.0, %v3268_v23 }
 0x197   : > { %919 = vrot.lane.b32.xlu0 %v903_v31, %s4696_s11 }
 0x19a   : > { %1086 = vrot.lane.b32.xlu1 %v3646_v9, %s4697_s15  ;;  %v1179_v9 = vmul.f32 %v3958_v60, %v3792_v17 }
 0x19b   : > { %1047 = vrot.lane.b32.xlu0 %v3771_v62, %s4694_s28  ;;  %v3975_v62 = vsel %vm1375_vm13, 1.0, %v3268_v23 }
 0x19c   : > { %v1407_v32 = vmul.f32 %v3975_v62, %v3814_v37 }
 0x19e   : > { %1088 = vrot.lane.b32.xlu1 %v3641_v5, %s4697_s15  ;;  %v1293_v5 = vmul.f32 %v3967_v4, %v3802_v39 }
 0x19f   : > { %1426 = vrot.lane.b32.xlu0 %v3781_v63, %s4692_s18 }
 0x1a2   : > { %1202 = vrot.lane.b32.xlu1 %v1179_v9, %s4693_s17 }
 0x1a3   : > { %1200 = vrot.lane.b32.xlu0 %v3796_v19, %s4693_s17 }
 0x1a6   : > { %1316 = vrot.lane.b32.xlu1 %v1293_v5, %s4695_s29 }
 0x1a7   : > { %1314 = vrot.lane.b32.xlu0 %v3806_v34, %s4695_s29  ;;  %s4699_s29 = sshll.u32 %s3519_s12, 6 }
 0x1a8   : > { %s475_s11 = scalar_lea.vmem [#allocation10], %s4699_s29 }
 0x1a9   : > { %s2487_s15 = sshll.u32 %s475_s11, 4  ;;  %s4594_s15 = int_to_ptr.vmem [resolvable:$true] %s2487_s15 }
 0x1aa   : > { %1430 = vrot.lane.b32.xlu1 %v1407_v32, %s4692_s18  ;;  %v2004_v32 = vld [vmem:[%s4649_s6] sm:$0xff]  ;;  %s3185_s26 = scalar_lea.vmem %s4594_s15, 1024  ;;  %p3192_p9 = scmp.lt.s32.totalorder %s4594_s15, %s3190_s30 }
 0x1ab   : > { %1428 = vrot.lane.b32.xlu0 %v3818_v0, %s4692_s18  ;;  %p3186_p0 = scmp.ne.s32.totalorder %s4594_s15, %s3185_s26 }
 0x1ad   : > { %p3187_p3 = pnand %p3186_p0, %p4701_p2 }
 0x1af   : > { %p3188_p7 = pneg %p3187_p3 }
 0x1c0   : > { %v1077_v63 = vpop.permute.xlu1 %1076 }
 0x1c1   : > { %v3985_v6 = vpop.permute.xlu0 %1074 }
 0x1c4   : > { %v1036_v7 = vpop.permute.xlu1 %1035 }
 0x1c5   : > { %v922_v8 = vpop.permute.xlu0 %921 }
 0x1c6   : > { %945 = vst.msk [vmem:[#allocation2 + $0x8] sm:$0xff] %vm943_vm14, %v922_v8  ;;  %v4063_v8 = vld [vmem:[%s4648_s5] ss:$0 sm:$0xff] }
 0x1c7   : > { %1059 = vst.msk [vmem:[#allocation2 + $0x8] sm:$0xff] %vm1057_vm15, %v1036_v7 }
 0x1c8   : > { %v3989_v17 = vpop.permute.xlu1 %1302  ;;  %1100 = vst.msk [vmem:[#allocation2 + $0x8] sm:$0xff] %vm1098_vm0, %v1077_v63  ;;  %v2005_v63 = vld [vmem:[%s4649_s6 + $0x8] sm:$0xff] }
 0x1c9   : > { %v3992_v19 = vpop.permute.xlu0 %1188  ;;  %v2899_v7 = vpack.c.bf16 %v2005_v63, %v2004_v32 }
 0x1cc   : > { %v3994_v39 = vpop.permute.xlu1 %1416 }
 0x1cd   : > { %v1191_v34 = vpop.permute.xlu0 %1190 }
 0x1ce   : > { %1214 = vst.msk [vmem:[#allocation2 + $0x8] sm:$0xff] %vm1212_vm7, %v1191_v34 }
 0x1d0   : > { %v1081_v37 = vpop.permute.xlu1 %1080 }
 0x1d1   : > { %v926_v0 = vpop.permute.xlu0 %925 }
 0x1d2   : > { %947 = vst.msk [vmem:[#allocation2 + $0x18] sm:$0xff] %vm943_vm14, %v926_v0 }
 0x1d4   : > { %v1079_v33 = vpop.permute.xlu1 %1078 }
 0x1d5   : > { %v1305_v18 = vpop.permute.xlu0 %1304 }
 0x1d6   : > { %1328 = vst.msk [vmem:[#allocation2 + $0x8] sm:$0xff] %vm1326_vm8, %v1305_v18 }
 0x1d8   : > { %v924_v22 = vpop.permute.xlu1 %923 }
 0x1d9   : > { %946 = vst.msk [vmem:[#allocation2 + $0x10] sm:$0xff] %vm943_vm14, %v924_v22  ;;  %v1040_v46 = vpop.permute.xlu0 %1039  ;;  %v2008_v22 = vld [vmem:[%s4649_s6 + $0x20] sm:$0xff] }
 0x1da   : > { %1061 = vst.msk [vmem:[#allocation2 + $0x18] sm:$0xff] %vm1057_vm15, %v1040_v46  ;;  %v2009_v46 = vld [vmem:[%s4649_s6 + $0x28] sm:$0xff] }
 0x1db   : > { %1102 = vst.msk [vmem:[#allocation2 + $0x18] sm:$0xff] %vm1098_vm0, %v1081_v37 }
 0x1dc   : > { %v1038_v10 = vpop.permute.xlu1 %1037 }
 0x1dd   : > { %1060 = vst.msk [vmem:[#allocation2 + $0x10] sm:$0xff] %vm1057_vm15, %v1038_v10  ;;  %v1419_v20 = vpop.permute.xlu0 %1418 }
 0x1de   : > { %1101 = vst.msk [vmem:[#allocation2 + $0x10] sm:$0xff] %vm1098_vm0, %v1079_v33 }
 0x1df   : > { %1442 = vst.msk [vmem:[#allocation2 + $0x8] sm:$0xff] %vm1440_vm9, %v1419_v20 }
 0x1e0   : > { %v1307_v21 = vpop.permute.xlu1 %1306 }
 0x1e1   : > { %v1193_v23 = vpop.permute.xlu0 %1192 }
 0x1e2   : > { %1215 = vst.msk [vmem:[#allocation2 + $0x10] sm:$0xff] %vm1212_vm7, %v1193_v23 }
 0x1e3   : > { %1329 = vst.msk [vmem:[#allocation2 + $0x10] sm:$0xff] %vm1326_vm8, %v1307_v21  ;;  %v2905_v21 = vpack.c.bf16 %v2009_v46, %v2008_v22 }
 0x1e4   : > { %v1421_v27 = vpop.permute.xlu1 %1420 }
 0x1e5   : > { %1443 = vst.msk [vmem:[#allocation2 + $0x10] sm:$0xff] %vm1440_vm9, %v1421_v27  ;;  %v1195_v28 = vpop.permute.xlu0 %1194 }
 0x1e6   : > { %1216 = vst.msk [vmem:[#allocation2 + $0x18] sm:$0xff] %vm1212_vm7, %v1195_v28  ;;  %v1450_v55 = vld [vmem:[#allocation2 + $0x8] sm:$0xff] }
 0x1e8   : > { %v1085_v11 = vpop.permute.xlu1 %1084 }
 0x1e9   : > { %v930_v42 = vpop.permute.xlu0 %929 }
 0x1ea   : > { %949 = vst.msk [vmem:[#allocation2 + $0x28] sm:$0xff] %vm943_vm14, %v930_v42 }
 0x1ec   : > { %v1083_v43 = vpop.permute.xlu1 %1082  ;;  %v1451_v1 = vld [vmem:[#allocation2 + $0x10] sm:$0xff] }
 0x1ed   : > { %v1309_v13 = vpop.permute.xlu0 %1308 }
 0x1ee   : > { %1330 = vst.msk [vmem:[#allocation2 + $0x18] sm:$0xff] %vm1326_vm8, %v1309_v13 }
 0x1f0   : > { %v928_v14 = vpop.permute.xlu1 %927 }
 0x1f1   : > { %948 = vst.msk [vmem:[#allocation2 + $0x20] sm:$0xff] %vm943_vm14, %v928_v14  ;;  %v1044_v15 = vpop.permute.xlu0 %1043 }
 0x1f2   : > { %1063 = vst.msk [vmem:[#allocation2 + $0x28] sm:$0xff] %vm1057_vm15, %v1044_v15 }
 0x1f3   : > { %1104 = vst.msk [vmem:[#allocation2 + $0x28] sm:$0xff] %vm1098_vm0, %v1085_v11 }
 0x1f4   : > { %v1042_v16 = vpop.permute.xlu1 %1041 }
 0x1f5   : > { %1062 = vst.msk [vmem:[#allocation2 + $0x20] sm:$0xff] %vm1057_vm15, %v1042_v16  ;;  %v1423_v52 = vpop.permute.xlu0 %1422 }
 0x1f6   : > { %1103 = vst.msk [vmem:[#allocation2 + $0x20] sm:$0xff] %vm1098_vm0, %v1083_v43 }
 0x1f7   : > { %1444 = vst.msk [vmem:[#allocation2 + $0x18] sm:$0xff] %vm1440_vm9, %v1423_v52 }
 0x1f8   : > { %v1311_v57 = vpop.permute.xlu1 %1310 }
 0x1f9   : > { %v1197_v25 = vpop.permute.xlu0 %1196 }
 0x1fa   : > { %1217 = vst.msk [vmem:[#allocation2 + $0x20] sm:$0xff] %vm1212_vm7, %v1197_v25 }
 0x1fb   : > { %1331 = vst.msk [vmem:[#allocation2 + $0x20] sm:$0xff] %vm1326_vm8, %v1311_v57 }
 0x1fc   : > { %v1425_v29 = vpop.permute.xlu1 %1424 }
 0x1fd   : > { %1445 = vst.msk [vmem:[#allocation2 + $0x20] sm:$0xff] %vm1440_vm9, %v1425_v29  ;;  %v1199_v30 = vpop.permute.xlu0 %1198 }
 0x1fe   : > { %1218 = vst.msk [vmem:[#allocation2 + $0x28] sm:$0xff] %vm1212_vm7, %v1199_v30  ;;  %v1452_v2 = vld [vmem:[#allocation2 + $0x18] sm:$0xff] }
 0x200   : > { %v932_v35 = vpop.permute.xlu1 %931 }
 0x201   : > { %950 = vst.msk [vmem:[#allocation2 + $0x30] sm:$0xff] %vm943_vm14, %v932_v35  ;;  %v934_v36 = vpop.permute.xlu0 %933 }
 0x202   : > { %951 = vst.msk [vmem:[#allocation2 + $0x38] sm:$0xff] %vm943_vm14, %v934_v36 }
 0x204   : > { %v1046_v38 = vpop.permute.xlu1 %1045  ;;  %v1453_v3 = vld [vmem:[#allocation2 + $0x20] sm:$0xff] }
 0x205   : > { %1064 = vst.msk [vmem:[#allocation2 + $0x30] sm:$0xff] %vm1057_vm15, %v1046_v38  ;;  %v1313_v44 = vpop.permute.xlu0 %1312 }
 0x206   : > { %1332 = vst.msk [vmem:[#allocation2 + $0x28] sm:$0xff] %vm1326_vm8, %v1313_v44 }
 0x208   : > { %v1034_v40 = vpop.permute.xlu1 %1033 }
 0x209   : > { %v920_v41 = vpop.permute.xlu0 %919 }
 0x20a   : > { %944 = vst.msk [vmem:[#allocation2] sm:$0xff] %vm943_vm14, %v920_v41 }
 0x20b   : > { %1058 = vst.msk [vmem:[#allocation2] sm:$0xff] %vm1057_vm15, %v1034_v40 }
 0x20c   : > { %1099 = vst.msk [vmem:[#allocation2] sm:$0xff] %vm1098_vm0, %v3985_v6  ;;  %v1087_v45 = vpop.permute.xlu1 %1086  ;;  %v3269_v6 = vmov 0.0|0.0  }
 0x20d   : > { %1213 = vst.msk [vmem:[#allocation2] sm:$0xff] %vm1212_vm7, %v3992_v19  ;;  %v1048_v47 = vpop.permute.xlu0 %1047  ;;  %2898 = vmatprep.subr.bf16.mxu0 %v3269_v6  ;;  %v2007_v19 = vld [vmem:[%s4649_s6 + $0x18] sm:$0xff] }
 0x20e   : > { %1105 = vst.msk [vmem:[#allocation2 + $0x30] sm:$0xff] %vm1098_vm0, %v1087_v45  ;;  %2900 = vmatpush1.bf16.msra.mxu0 %v2899_v7 }
 0x20f   : > { %1327 = vst.msk [vmem:[#allocation2] sm:$0xff] %vm1326_vm8, %v3989_v17  ;;  %2901 = vmatprep.subr.bf16.mxu0 %v3269_v6  ;;  %v2006_v17 = vld [vmem:[%s4649_s6 + $0x10] sm:$0xff] }
 0x210   : > { %1065 = vst.msk [vmem:[#allocation2 + $0x38] sm:$0xff] %vm1057_vm15, %v1048_v47  ;;  %v1089_v48 = vpop.permute.xlu1 %1088 }
 0x211   : > { %1441 = vst.msk [vmem:[#allocation2] sm:$0xff] %vm1440_vm9, %v3994_v39  ;;  %v1427_v24 = vpop.permute.xlu0 %1426  ;;  %v2902_v39 = vpack.c.bf16 %v2007_v19, %v2006_v17 }
 0x212   : > { %1106 = vst.msk [vmem:[#allocation2 + $0x38] sm:$0xff] %vm1098_vm0, %v1089_v48 }
 0x213   : > { %1446 = vst.msk [vmem:[#allocation2 + $0x28] sm:$0xff] %vm1440_vm9, %v1427_v24  ;;  %2903 = vmatpush1.bf16.msra.mxu0 %v2902_v39 }
 0x214   : > { %v1203_v49 = vpop.permute.xlu1 %1202  ;;  %2904 = vmatprep.subr.bf16.mxu0 %v3269_v6 }
 0x215   : > { %1220 = vst.msk [vmem:[#allocation2 + $0x38] sm:$0xff] %vm1212_vm7, %v1203_v49  ;;  %v1201_v50 = vpop.permute.xlu0 %1200 }
 0x216   : > { %1219 = vst.msk [vmem:[#allocation2 + $0x30] sm:$0xff] %vm1212_vm7, %v1201_v50 }
 0x217   : > { %2906 = vmatpush1.bf16.msra.mxu0 %v2905_v21 }
 0x218   : > { %v1449_v53 = vld [vmem:[#allocation2] sm:$0xff]  ;;  %v1317_v56 = vpop.permute.xlu1 %1316  ;;  %2907 = vmatprep.subr.bf16.mxu0 %v3269_v6 }
 0x219   : > { %2770 = vmatprep.mubr.msk.f32.mxu1 %vm1478_vm10, %v1449_v53  ;;  %1334 = vst.msk [vmem:[#allocation2 + $0x38] sm:$0xff] %vm1326_vm8, %v1317_v56  ;;  %v1315_v58 = vpop.permute.xlu0 %1314 }
 0x21a   : > { %2771 = vmatmul.mubr.msk.f32.vlgmr.msra.gmra.mrb[8].mxu1 %vm1478_vm10, %v1450_v55  ;;  %1333 = vst.msk [vmem:[#allocation2 + $0x30] sm:$0xff] %vm1326_vm8, %v1315_v58  ;;  %v1454_v61 = vld [vmem:[#allocation2 + $0x28] sm:$0xff] }
 0x21b   : > { %2773 = vmatprep.mubr.msk.f32.mxu1 %vm1478_vm10, %v1451_v1 }
 0x21c   : > { %v1431_v31 = vpop.permute.xlu1 %1430 }
 0x21d   : > { %1448 = vst.msk [vmem:[#allocation2 + $0x38] sm:$0xff] %vm1440_vm9, %v1431_v31  ;;  %v1429_v59 = vpop.permute.xlu0 %1428 }
 0x21e   : > { %2774 = vmatmul.mubr.msk.f32.gmra.mrb[10].mxu1 %vm1478_vm10, %v1452_v2  ;;  %1447 = vst.msk [vmem:[#allocation2 + $0x30] sm:$0xff] %vm1440_vm9, %v1429_v59 }
 0x21f   : > { %2776 = vmatprep.mubr.msk.f32.mxu1 %vm1478_vm10, %v1453_v3 }
 0x222   : > { %2777 = vmatmul.mubr.msk.f32.gmra.mrb[12].mxu1 %vm1478_vm10, %v1454_v61 }
 0x224   : > { %v1456_v5 = vld [vmem:[#allocation2 + $0x38] sm:$0xff] }
 0x225   : > { %v1455_v9 = vld [vmem:[#allocation2 + $0x30] sm:$0xff] }
 0x226   : > { %2779 = vmatprep.mubr.msk.f32.mxu1 %vm1478_vm10, %v1455_v9 }
 0x227   : > { %2780 = vmatmul.mubr.msk.f32.gmra.mrb[14].mxu1 %vm1478_vm10, %v1456_v5 }
 0x2ed   : > { %v2772_v34 = vpop.f32.mrb[8].mxu1 }
 0x2ee   : > { %v1575_v37 = vadd.f32 %v2772_v34, %v4063_v8  ;;  %v1569_v0 = vpop.f32.mrb[9].mxu1 }
 0x2ef   : > { %v1570_v33 = vadd.f32 %v4063_v8, %v1569_v0 }
 0x2f0   : > { %v1609_v18 = vmul.f32 0.2, %v1575_v37 }
 0x2f1   : > { %v1608_v10 = vmul.f32 0.2, %v1570_v33  ;;  %v2775_v20 = vpop.f32.mrb[10].mxu1 }
 0x2f2   : > { %v4081_v23 = vmax.f32 %v1575_v37, %v1609_v18  ;;  %v1585_v27 = vadd.f32 %v2775_v20, %v4063_v8  ;;  %v1579_v28 = vpop.f32.mrb[11].mxu1 }
 0x2f3   : > { %v4084_v11 = vmax.f32 %v1570_v33, %v1608_v10  ;;  %v1580_v42 = vadd.f32 %v4063_v8, %v1579_v28 }
 0x2f4   : > { %v1611_v43 = vmul.f32 0.2, %v1585_v27  ;;  %1797 = vrot.lane.b32.xlu1 %v4081_v23, %s4692_s18  ;;  %v1861_v13 = vrot.slane %v4081_v23, 2  ;;  %v1925_v14 = vrot.slane %v4081_v23, 3  ;;  %v1658_v15 = vrot.slane %v4081_v23, 6 }
 0x2f5   : > { %v1610_v16 = vmul.f32 0.2, %v1580_v42  ;;  %v2778_v52 = vpop.f32.mrb[12].mxu1  ;;  %1795 = vrot.lane.b32.xlu0 %v4084_v11, %s4692_s18  ;;  %v1860_v57 = vrot.slane %v4084_v11, 2  ;;  %v1924_v25 = vrot.slane %v4084_v11, 3  ;;  %v1657_v29 = vrot.slane %v4084_v11, 6 }
 0x2f6   : > { %v4098_v30 = vmax.f32 %v1585_v27, %v1611_v43  ;;  %v1595_v35 = vadd.f32 %v2778_v52, %v4063_v8  ;;  %v1589_v36 = vpop.f32.mrb[13].mxu1  ;;  %v1722_v38 = vrot.slane %v4084_v11, 7  ;;  %v1723_v44 = vrot.slane %v4081_v23, 7 }
 0x2f7   : > { %v4103_v40 = vmax.f32 %v1580_v42, %v1610_v16  ;;  %v1590_v41 = vadd.f32 %v4063_v8, %v1589_v36  ;;  %v1874_v45 = vsel %vm1229_vm3, %v1860_v57, %v1861_v13  ;;  %v1938_v47 = vsel %vm1343_vm5, %v1924_v25, %v1925_v14 }
 0x2f8   : > { %v1613_v48 = vmul.f32 0.2, %v1595_v35  ;;  %1892 = vrot.lane.b32.xlu1 %v1874_v45, %s4694_s28  ;;  %v1671_v24 = vsel %vm846_vm2, %v1657_v29, %v1658_v15  ;;  %v1736_v49 = vsel %vm960_vm1, %v1722_v38, %v1723_v44  ;;  %v1863_v50 = vrot.slane %v4098_v30, 2 }
 0x2f9   : > { %v1612_v53 = vmul.f32 0.2, %v1590_v41  ;;  %1799 = vrot.lane.b32.xlu0 %v4103_v40, %s4692_s18  ;;  %v1862_v55 = vrot.slane %v4103_v40, 2  ;;  %v1926_v56 = vrot.slane %v4103_v40, 3  ;;  %v1659_v1 = vrot.slane %v4103_v40, 6 }
 0x2fa   : > { %v4129_v58 = vmax.f32 %v1595_v35, %v1613_v48  ;;  %v1724_v2 = vrot.slane %v4103_v40, 7  ;;  %v1927_v31 = vrot.slane %v4098_v30, 3  ;;  %v1660_v3 = vrot.slane %v4098_v30, 6  ;;  %v2781_v32 = vpop.f32.mrb[14].mxu1 }
 0x2fb   : > { %v4134_v59 = vmax.f32 %v1590_v41, %v1612_v53  ;;  %v1873_v61 = vsel %vm1229_vm3, %v1861_v13, %v1862_v55  ;;  %v1937_v9 = vsel %vm1343_vm5, %v1925_v14, %v1926_v56  ;;  %v1670_v5 = vsel %vm846_vm2, %v1658_v15, %v1659_v1  ;;  %v1599_v34 = vpop.f32.mrb[15].mxu1 }
 0x2fc   : > { %1956 = vrot.lane.b32.xlu1 %v1938_v47, %s4693_s17  ;;  %v1735_v63 = vsel %vm960_vm1, %v1723_v44, %v1724_v2  ;;  %v4147_v7 = vsel %vm1229_vm3, %v1862_v55, %v1863_v50  ;;  %v4151_v17 = vsel %vm1343_vm5, %v1926_v56, %v1927_v31  ;;  %v4155_v19 = vsel %vm846_vm2, %v1659_v1, %v1660_v3 }
 0x2fd   : > { %v1605_v39 = vadd.f32 %v2781_v32, %v4063_v8  ;;  %1894 = vrot.lane.b32.xlu0 %v1873_v61, %s4694_s28  ;;  %v1864_v37 = vrot.slane %v4134_v59, 2  ;;  %v1928_v0 = vrot.slane %v4134_v59, 3  ;;  %v1725_v33 = vrot.slane %v4098_v30, 7  ;;  %v2010_v32 = vld [vmem:[%s4649_s6 + $0x30] sm:$0xff] }
 0x2fe   : > { %v1600_v18 = vadd.f32 %v4063_v8, %v1599_v34  ;;  %v1661_v22 = vrot.slane %v4134_v59, 6  ;;  %v1865_v46 = vrot.slane %v4129_v58, 2  ;;  %v1726_v10 = vrot.slane %v4134_v59, 7 }
 0x2ff   : > { %v1615_v20 = vmul.f32 0.2, %v1605_v39  ;;  %v4168_v21 = vsel %vm1229_vm3, %v1863_v50, %v1864_v37  ;;  %v4172_v27 = vsel %vm1343_vm5, %v1927_v31, %v1928_v0  ;;  %v4176_v28 = vsel %vm960_vm1, %v1724_v2, %v1725_v33 }
 0x300   : > { %v1614_v8 = vmul.f32 0.2, %v1600_v18  ;;  %1691 = vrot.lane.b32.xlu1 %v1671_v24, %s4694_s28  ;;  %v4181_v42 = vsel %vm846_vm2, %v1660_v3, %v1661_v22  ;;  %v4185_v43 = vsel %vm1229_vm3, %v1864_v37, %v1865_v46  ;;  %v4189_v13 = vsel %vm960_vm1, %v1725_v33, %v1726_v10 }
 0x301   : > { %v4191_v14 = vmax.f32 %v1605_v39, %v1615_v20  ;;  %1958 = vrot.lane.b32.xlu0 %v1937_v9, %s4693_s17  ;;  %v1929_v15 = vrot.slane %v4129_v58, 3  ;;  %v1662_v16 = vrot.slane %v4129_v58, 6  ;;  %v1727_v52 = vrot.slane %v4129_v58, 7  ;;  %v2011_v39 = vld [vmem:[%s4649_s6 + $0x38] sm:$0xff] }
 0x302   : > { %v4197_v35 = vmax.f32 %v1600_v18, %v1614_v8  ;;  %v1829_v36 = vrot.slane %v4081_v23, 1  ;;  %v1828_v44 = vrot.slane %v4084_v11, 1  ;;  %v2908_v20 = vpack.c.bf16 %v2011_v39, %v2010_v32  ;;  %v2017_v39 = vld [vmem:[%s4649_s6 + $0x68] sm:$0xff] }
 0x303   : > { %v4203_v41 = vsel %vm1343_vm5, %v1928_v0, %v1929_v15  ;;  %v1664_v45 = vrot.slane %v4191_v14, 6  ;;  %v4208_v47 = vsel %vm846_vm2, %v1661_v22, %v1662_v16  ;;  %v1729_v48 = vrot.slane %v4191_v14, 7  ;;  %v2013_v22 = vld [vmem:[%s4649_s6 + $0x48] sm:$0xff] }
 0x304   : > { %1756 = vrot.lane.b32.xlu1 %v1736_v49, %s4693_s17  ;;  %v4214_v24 = vsel %vm960_vm1, %v1726_v10, %v1727_v52  ;;  %v1866_v50 = vrot.slane %v4197_v35, 2  ;;  %v1930_v53 = vrot.slane %v4197_v35, 3  ;;  %v1867_v55 = vrot.slane %v4191_v14, 2  ;;  %2909 = vmatpush1.bf16.msra.mxu0 %v2908_v20 }
 0x305   : > { %1693 = vrot.lane.b32.xlu0 %v1670_v5, %s4694_s28  ;;  %v4224_v56 = vsel %vm846_vm2, %v1664_v45, %v1657_v29  ;;  %v4230_v49 = vsel %vm960_vm1, %v1729_v48, %v1722_v38  ;;  %v1663_v1 = vrot.slane %v4197_v35, 6  ;;  %v1931_v2 = vrot.slane %v4191_v14, 3  ;;  %2910 = vmatprep.subr.bf16.mxu0 %v3269_v6 }
 0x306   : > { %v4236_v31 = vsel %vm1229_vm3, %v1865_v46, %v1866_v50  ;;  %v4240_v3 = vsel %vm1343_vm5, %v1929_v15, %v1930_v53  ;;  %v1830_v29 = vrot.slane %v4103_v40, 1  ;;  %v4245_v61 = vsel %vm1229_vm3, %v1866_v50, %v1867_v55  ;;  %v2014_v15 = vld [vmem:[%s4649_s6 + $0x50] sm:$0xff] }
 0x307   : > { %v4249_v38 = vsel %vm846_vm2, %v1662_v16, %v1663_v1  ;;  %v4253_v9 = vsel %vm1343_vm5, %v1930_v53, %v1931_v2  ;;  %v1728_v5 = vrot.slane %v4197_v35, 7  ;;  %v4266_v34 = vsel %vm846_vm2, %v1663_v1, %v1664_v45  ;;  %v2015_v16 = vld [vmem:[%s4649_s6 + $0x58] sm:$0xff] }
 0x308   : > { %1801 = vrot.lane.b32.xlu1 %v4098_v30, %s4692_s18  ;;  %v4272_v37 = vsel %vm1229_vm3, %v1867_v55, %v1860_v57  ;;  %v4278_v0 = vsel %vm1343_vm5, %v1931_v2, %v1924_v25  ;;  %v1842_v33 = vsel %vm1115_vm4, %v1828_v44, %v1829_v36  ;;  %v2012_v25 = vld [vmem:[%s4649_s6 + $0x40] sm:$0xff]  ;;  %v1625_v46 = vrot.slane %v4081_v23, 5 }
 0x309   : > { %1758 = vrot.lane.b32.xlu0 %v1735_v63, %s4693_s17  ;;  %v4287_v18 = vsel %vm960_vm1, %v1727_v52, %v1728_v5  ;;  %v4291_v57 = vsel %vm960_vm1, %v1728_v5, %v1729_v48  ;;  %1852 = vst.msk [vmem:[#allocation3 + $0x8] sm:$0xff] %vm1648_vm11, %v1842_v33  ;;  %v1841_v63 = vsel %vm1115_vm4, %v1829_v36, %v1830_v29  ;;  %v1624_v10 = vrot.slane %v4084_v11, 5  ;;  %v2019_v11 = vld [vmem:[%s4649_s6 + $0x78] sm:$0xff] }
 0x30a   : > { %1853 = vst.msk [vmem:[#allocation3 + $0x18] sm:$0xff] %vm1648_vm11, %v1841_v63  ;;  %v1626_v8 = vrot.slane %v4103_v40, 5  ;;  %v2911_v52 = vpack.c.bf16 %v2013_v22, %v2012_v25  ;;  %v1831_v36 = vrot.slane %v4098_v30, 1  ;;  %v1832_v45 = vrot.slane %v4134_v59, 1 }
 0x30b   : > { %v1638_v23 = vsel %vm764_vm6, %v1624_v10, %v1625_v46  ;;  %v2914_v48 = vpack.c.bf16 %v2015_v16, %v2014_v15  ;;  %v1628_v53 = vrot.slane %v4134_v59, 5  ;;  %v1833_v2 = vrot.slane %v4129_v58, 1 }
 0x30c   : > { %1896 = vrot.lane.b32.xlu1 %v4147_v7, %s4694_s28  ;;  %1650 = vst.msk [vmem:[#allocation3 + $0x10] sm:$0xff] %vm1648_vm11, %v1638_v23  ;;  %v1637_v40 = vsel %vm764_vm6, %v1625_v46, %v1626_v8  ;;  %v1627_v7 = vrot.slane %v4098_v30, 5  ;;  %v1840_v50 = vsel %vm1115_vm4, %v1830_v29, %v1831_v36  ;;  %v1839_v55 = vsel %vm1115_vm4, %v1831_v36, %v1832_v45  ;;  %v2027_v36 = vld [vmem:[%s4649_s6 + $0xb8] sm:$0xff] }
 0x30d   : > { %1803 = vrot.lane.b32.xlu0 %v4134_v59, %s4692_s18  ;;  %1651 = vst.msk [vmem:[#allocation3 + $0x20] sm:$0xff] %vm1648_vm11, %v1637_v40  ;;  %1854 = vst.msk [vmem:[#allocation3 + $0x28] sm:$0xff] %vm1648_vm11, %v1840_v50  ;;  %v1631_v30 = vrot.slane %v4191_v14, 5  ;;  %2912 = vmatpush1.bf16.msra.mxu0 %v2911_v52  ;;  %v1629_v29 = vrot.slane %v4129_v58, 5  ;;  %v1834_v5 = vrot.slane %v4197_v35, 1  ;;  %v1835_v32 = vrot.slane %v4191_v14, 1 }
 0x30e   : > { %v1636_v1 = vsel %vm764_vm6, %v1626_v8, %v1627_v7  ;;  %1855 = vst.msk [vmem:[#allocation3 + $0x38] sm:$0xff] %vm1648_vm11, %v1839_v55  ;;  %v1635_v59 = vsel %vm764_vm6, %v1627_v7, %v1628_v53  ;;  %2913 = vmatprep.subr.bf16.mxu0 %v3269_v6  ;;  %v1838_v33 = vsel %vm1115_vm4, %v1832_v45, %v1833_v2  ;;  %v2025_v52 = vld [vmem:[%s4649_s6 + $0xa8] sm:$0xff]  ;;  %v2031_v40 = vld [vmem:[%s4649_s6 + $0xd8] sm:$0xff]  ;;  %v2197_v7 = vld [vmem:[#allocation7 + $0x20] sm:$0xff]  ;;  %vm1713_vm1 = vcmask 523520  }
 0x30f   : > { %1652 = vst.msk [vmem:[#allocation3 + $0x30] sm:$0xff] %vm1648_vm11, %v1636_v1  ;;  %1653 = vst.msk [vmem:[#allocation3 + $0x40] sm:$0xff] %vm1648_vm11, %v1635_v59  ;;  %v1639_v25 = vsel %vm764_vm6, %v1631_v30, %v1624_v10  ;;  %v1634_v63 = vsel %vm764_vm6, %v1628_v53, %v1629_v29  ;;  %v1837_v46 = vsel %vm1115_vm4, %v1833_v2, %v1834_v5  ;;  %v2196_v45 = vld [vmem:[#allocation7 + $0x18] sm:$0xff]  ;;  %v2201_v50 = vld [vmem:[#allocation7 + $0x40] sm:$0xff]  ;;  %vm1778_vm2 = vcmask 785920  }
 0x310   : > { %1960 = vrot.lane.b32.xlu1 %v4151_v17, %s4693_s17  ;;  %v2016_v17 = vld [vmem:[%s4649_s6 + $0x60] sm:$0xff]  ;;  %1856 = vst.msk [vmem:[#allocation3 + $0x48] sm:$0xff] %vm1648_vm11, %v1838_v33  ;;  %v1640_v22 = vmul.f32 %v3836_v26, %v1639_v25  ;;  %1654 = vst.msk [vmem:[#allocation3 + $0x50] sm:$0xff] %vm1648_vm11, %v1634_v63  ;;  %v1836_v20 = vsel %vm1115_vm4, %v1834_v5, %v1835_v32  ;;  %v1843_v26 = vsel %vm1115_vm4, %v1835_v32, %v1828_v44  ;;  %v2023_v44 = vld [vmem:[%s4649_s6 + $0x98] sm:$0xff]  ;;  %vm2032_vm3 = vcmask 785408  }
 0x311   : > { %1898 = vrot.lane.b32.xlu0 %v4168_v21, %s4694_s28  ;;  %v1630_v21 = vrot.slane %v4197_v35, 5  ;;  %1857 = vst.msk [vmem:[#allocation3 + $0x58] sm:$0xff] %vm1648_vm11, %v1837_v46  ;;  %2915 = vmatpush1.bf16.msra.mxu0 %v2914_v48  ;;  %v2917_v15 = vpack.c.bf16 %v2017_v39, %v2016_v17  ;;  %1858 = vst.msk [vmem:[#allocation3 + $0x68] sm:$0xff] %vm1648_vm11, %v1836_v20  ;;  %v1851_v16 = vmul.f32 %v3958_v60, %v1843_v26  ;;  %v2198_v48 = vld [vmem:[#allocation7 + $0x28] sm:$0xff]  ;;  %vm1819_vm4 = vcmask 1048320  }
 0x312   : > { %1649 = vst.msk [vmem:[#allocation3] sm:$0xff] %vm1648_vm11, %v1640_v22  ;;  %2916 = vmatprep.subr.bf16.mxu0 %v3269_v6  ;;  %v2920_v60 = vpack.c.bf16 %v2019_v11, %v2018_v12  ;;  %v1673_v23 = vmul.f32 %v3937_v54, %v4224_v56  ;;  %v1738_v54 = vmul.f32 %v3932_v51, %v4230_v49  ;;  %v2026_v56 = vld [vmem:[%s4649_s6 + $0xb0] sm:$0xff]  ;;  %v2029_v49 = vld [vmem:[%s4649_s6 + $0xc8] sm:$0xff] }
 0x313   : > { %v1633_v10 = vsel %vm764_vm6, %v1629_v29, %v1630_v21  ;;  %v1632_v8 = vsel %vm764_vm6, %v1630_v21, %v1631_v30  ;;  %1859 = vst.msk [vmem:[#allocation3 + $0x78] sm:$0xff] %vm1648_vm11, %v1851_v16  ;;  %v2932_v51 = vpack.c.bf16 %v2027_v36, %v2026_v56  ;;  %v2202_v53 = vld [vmem:[#allocation7 + $0x48] sm:$0xff] }
 0x314   : > { %1695 = vrot.lane.b32.xlu1 %v4155_v19, %s4694_s28  ;;  %1655 = vst.msk [vmem:[#allocation3 + $0x60] sm:$0xff] %vm1648_vm11, %v1633_v10  ;;  %1656 = vst.msk [vmem:[#allocation3 + $0x70] sm:$0xff] %vm1648_vm11, %v1632_v8  ;;  %v2020_v19 = vld [vmem:[%s4649_s6 + $0x80] sm:$0xff] }
 0x315   : > { %1962 = vrot.lane.b32.xlu0 %v4172_v27, %s4693_s17  ;;  %2918 = vmatpush1.bf16.msra.mxu0 %v2917_v15  ;;  %v2021_v27 = vld [vmem:[%s4649_s6 + $0x88] sm:$0xff] }
 0x316   : > { %2919 = vmatprep.subr.bf16.mxu0 %v3269_v6 }
 0x318   : > { %1760 = vrot.lane.b32.xlu1 %v4176_v28, %s4693_s17  ;;  %v2923_v28 = vpack.c.bf16 %v2021_v27, %v2020_v19 }
 0x319   : > { %1697 = vrot.lane.b32.xlu0 %v4181_v42, %s4694_s28  ;;  %2921 = vmatpush1.bf16.msra.mxu0 %v2920_v60  ;;  %v2022_v42 = vld [vmem:[%s4649_s6 + $0x90] sm:$0xff] }
 0x31a   : > { %2922 = vmatprep.subr.bf16.mxu0 %v3269_v6 }
 0x31c   : > { %1900 = vrot.lane.b32.xlu1 %v4185_v43, %s4694_s28  ;;  %v2926_v43 = vpack.c.bf16 %v2023_v44, %v2022_v42 }
 0x31d   : > { %1762 = vrot.lane.b32.xlu0 %v4189_v13, %s4693_s17  ;;  %2924 = vmatpush1.bf16.msra.mxu0 %v2923_v28  ;;  %v2024_v13 = vld [vmem:[%s4649_s6 + $0xa0] sm:$0xff] }
 0x31e   : > { %2925 = vmatprep.subr.bf16.mxu0 %v3269_v6 }
 0x320   : > { %1964 = vrot.lane.b32.xlu1 %v4203_v41, %s4693_s17  ;;  %v2929_v41 = vpack.c.bf16 %v2025_v52, %v2024_v13 }
 0x321   : > { %1689 = vrot.lane.b32.xlu0 %v1673_v23, %s4694_s28  ;;  %2927 = vmatpush1.bf16.msra.mxu0 %v2926_v43 }
 0x322   : > { %2928 = vmatprep.subr.bf16.mxu0 %v3269_v6 }
 0x324   : > { %1699 = vrot.lane.b32.xlu1 %v4208_v47, %s4694_s28  ;;  %v2028_v47 = vld [vmem:[%s4649_s6 + $0xc0] sm:$0xff] }
 0x325   : > { %1754 = vrot.lane.b32.xlu0 %v1738_v54, %s4693_s17  ;;  %2930 = vmatpush1.bf16.msra.mxu0 %v2929_v41 }
 0x326   : > { %2931 = vmatprep.subr.bf16.mxu0 %v3269_v6 }
 0x328   : > { %1764 = vrot.lane.b32.xlu1 %v4214_v24, %s4693_s17  ;;  %v2935_v24 = vpack.c.bf16 %v2029_v49, %v2028_v47 }
 0x329   : > { %1902 = vrot.lane.b32.xlu0 %v4236_v31, %s4694_s28  ;;  %2933 = vmatpush1.bf16.msra.mxu0 %v2932_v51  ;;  %v2030_v31 = vld [vmem:[%s4649_s6 + $0xd0] sm:$0xff] }
 0x32a   : > { %2934 = vmatprep.subr.bf16.mxu0 %v3269_v6 }
 0x32c   : > { %1805 = vrot.lane.b32.xlu1 %v4129_v58, %s4692_s18  ;;  %v2938_v58 = vpack.c.bf16 %v2031_v40, %v2030_v31 }
 0x32d   : > { %1966 = vrot.lane.b32.xlu0 %v4240_v3, %s4693_s17  ;;  %2936 = vmatpush1.bf16.msra.mxu0 %v2935_v24  ;;  %v1883_v3 = vmul.f32 %v3967_v4, %v4272_v37  ;;  %v2948_v4 = vpack.c.bf16 %v2198_v48, %v2197_v7  ;;  %v2200_v37 = vld [vmem:[#allocation7 + $0x38] sm:$0xff]  ;;  %v2203_v48 = vld [vmem:[#allocation7 + $0x50] sm:$0xff] }
 0x32e   : > { %2937 = vmatprep.subr.bf16.mxu0 %v3269_v6  ;;  %v2193_v6 = vld [vmem:[#allocation7] sm:$0xff] }
 0x330   : > { %1904 = vrot.lane.b32.xlu1 %v4245_v61, %s4694_s28  ;;  %v2194_v61 = vld [vmem:[#allocation7 + $0x8] sm:$0xff] }
 0x331   : > { %1701 = vrot.lane.b32.xlu0 %v4249_v38, %s4694_s28  ;;  %2939 = vmatpush1.bf16.msra.mxu0 %v2938_v58  ;;  %v2195_v38 = vld [vmem:[#allocation7 + $0x10] sm:$0xff] }
 0x334   : > { %1968 = vrot.lane.b32.xlu1 %v4253_v9, %s4693_s17  ;;  %v2940_v9 = vpack.c.bf16 %v2194_v61, %v2193_v6 }
 0x335   : > { %1766 = vrot.lane.b32.xlu0 %v4287_v18, %s4693_s17  ;;  %v1947_v18 = vmul.f32 %v3975_v62, %v4278_v0  ;;  %v2956_v62 = vpack.c.bf16 %v2202_v53, %v2201_v50  ;;  %v2207_v53 = vld [vmem:[#allocation7 + $0x70] sm:$0xff] }
 0x336   : > { %2941 = vmatprep.subr.bf16.mxu1 %v2940_v9 }
 0x337   : > { %2943 = vmatpush3.bf16.msra.mxu1 %v2940_v9 }
 0x338   : > { %1703 = vrot.lane.b32.xlu1 %v4266_v34, %s4694_s28  ;;  %v2944_v34 = vpack.c.bf16 %v2196_v45, %v2195_v38 }
 0x339   : > { %1807 = vrot.lane.b32.xlu0 %v4197_v35, %s4692_s18  ;;  %v2199_v35 = vld [vmem:[#allocation7 + $0x30] sm:$0xff] }
 0x33a   : > { %2945 = vmatprep.subr.bf16.mxu1 %v2944_v34 }
 0x33b   : > { %2947 = vmatpush3.bf16.msra.mxu1 %v2944_v34 }
 0x33c   : > { %1768 = vrot.lane.b32.xlu1 %v4291_v57, %s4693_s17  ;;  %2949 = vmatprep.subr.bf16.mxu1 %v2948_v4  ;;  %v2952_v57 = vpack.c.bf16 %v2200_v37, %v2199_v35  ;;  %v2205_v37 = vld [vmem:[#allocation7 + $0x60] sm:$0xff] }
 0x33d   : > { %1906 = vrot.lane.b32.xlu0 %v1883_v3, %s4694_s28 }
 0x33f   : > { %2951 = vmatpush3.bf16.msra.mxu1 %v2948_v4  ;;  %v2204_v4 = vld [vmem:[#allocation7 + $0x58] sm:$0xff] }
 0x340   : > { %1809 = vrot.lane.b32.xlu1 %v4191_v14, %s4692_s18  ;;  %2953 = vmatprep.subr.bf16.mxu1 %v2952_v57  ;;  %v2960_v35 = vpack.c.bf16 %v2204_v4, %v2203_v48  ;;  %s4700_s18 = sld [smem:[#allocation17_spill]] }
 0x341   : > { %1970 = vrot.lane.b32.xlu0 %v1947_v18, %s4693_s17  ;;  %s2474_s17 = scalar_lea.sflag [#allocation6], %s3519_s12 }
 0x343   : > { %2955 = vmatpush3.bf16.msra.mxu1 %v2952_v57  ;;  %v2206_v57 = vld [vmem:[#allocation7 + $0x68] sm:$0xff] }
 0x344   : > { %2957 = vmatprep.subr.bf16.mxu1 %v2956_v62  ;;  %v2964_v50 = vpack.c.bf16 %v2206_v57, %v2205_v37 }
 0x347   : > { %2959 = vmatpush3.bf16.msra.mxu1 %v2956_v62  ;;  %v2208_v62 = vld [vmem:[#allocation7 + $0x78] sm:$0xff] }
 0x348   : > { %2961 = vmatprep.subr.bf16.mxu1 %v2960_v35 }
 0x34b   : > { %2963 = vmatpush3.bf16.msra.mxu1 %v2960_v35  ;;  %v600_v35 = vld [vmem:[%s3525_s14 + $0x30] sm:$0xff] }
 0x34c   : > { %2965 = vmatprep.subr.bf16.mxu1 %v2964_v50 }
 0x34f   : > { %2967 = vmatpush3.bf16.msra.mxu1 %v2964_v50 }
 0x366   : > { %v1798_v14 = vpop.permute.xlu1 %1797 }
 0x367   : > { %v1796_v0 = vpop.permute.xlu0 %1795 }
 0x36a   : > { %v1893_v55 = vpop.permute.xlu1 %1892 }
 0x36b   : > { %1916 = vst.msk [vmem:[#allocation3 + $0x8] sm:$0xff] %vm1713_vm1, %v1893_v55  ;;  %v1800_v1 = vpop.permute.xlu0 %1799  ;;  %v2338_v55 = vld [vmem:[#allocation9 + $0x8] sm:$0xff] }
 0x36e   : > { %v1957_v2 = vpop.permute.xlu1 %1956 }
 0x36f   : > { %1980 = vst.msk [vmem:[#allocation3 + $0x8] sm:$0xff] %vm1778_vm2, %v1957_v2  ;;  %v1895_v30 = vpop.permute.xlu0 %1894 }
 0x370   : > { %1917 = vst.msk [vmem:[#allocation3 + $0x18] sm:$0xff] %vm1713_vm1, %v1895_v30  ;;  %v2340_v30 = vld [vmem:[#allocation9 + $0x18] sm:$0xff] }
 0x372   : > { %v1692_v59 = vpop.permute.xlu1 %1691 }
 0x373   : > { %1715 = vst.msk [vmem:[#allocation3 + $0x10] sm:$0xff] %vm1713_vm1, %v1692_v59  ;;  %v1959_v29 = vpop.permute.xlu0 %1958 }
 0x374   : > { %1981 = vst.msk [vmem:[#allocation3 + $0x18] sm:$0xff] %vm1778_vm2, %v1959_v29  ;;  %v2341_v29 = vld [vmem:[#allocation9 + $0x20] sm:$0xff] }
 0x376   : > { %v1757_v5 = vpop.permute.xlu1 %1756  ;;  %v1989_v32 = vld [vmem:[#allocation3 + $0x8] sm:$0xff] }
 0x377   : > { %1780 = vst.msk [vmem:[#allocation3 + $0x10] sm:$0xff] %vm1778_vm2, %v1757_v5  ;;  %v1694_v17 = vpop.permute.xlu0 %1693  ;;  %2630 = vmatprep.mubr.msk.f32.mxu0 %vm2032_vm3, %v1989_v32  ;;  %v2342_v5 = vld [vmem:[#allocation9 + $0x28] sm:$0xff] }
 0x378   : > { %1821 = vst.msk [vmem:[#allocation3 + $0x10] sm:$0xff] %vm1819_vm4, %v1798_v14  ;;  %v2968_v14 = vpack.c.bf16 %v2208_v62, %v2207_v53  ;;  %v4537_v32 = vpack.c.bf16 %v2342_v5, %v2341_v29 }
 0x379   : > { %1716 = vst.msk [vmem:[#allocation3 + $0x20] sm:$0xff] %vm1713_vm1, %v1694_v17  ;;  %v2343_v17 = vld [vmem:[#allocation9 + $0x30] sm:$0xff] }
 0x37a   : > { %v1802_v39 = vpop.permute.xlu1 %1801  ;;  %2969 = vmatprep.subr.bf16.mxu1 %v2968_v14 }
 0x37b   : > { %v1759_v33 = vpop.permute.xlu0 %1758  ;;  %v1991_v23 = vld [vmem:[#allocation3 + $0x18] sm:$0xff]  ;;  %2971 = vmatpush3.bf16.msra.mxu1 %v2968_v14 }
 0x37c   : > { %1781 = vst.msk [vmem:[#allocation3 + $0x20] sm:$0xff] %vm1778_vm2, %v1759_v33 }
 0x37d   : > { %1822 = vst.msk [vmem:[#allocation3 + $0x20] sm:$0xff] %vm1819_vm4, %v1800_v1  ;;  %v2339_v1 = vld [vmem:[#allocation9 + $0x10] sm:$0xff] }
 0x37e   : > { %v1897_v25 = vpop.permute.xlu1 %1896  ;;  %v4534_v59 = vpack.c.bf16 %v2340_v30, %v2339_v1 }
 0x37f   : > { %1918 = vst.msk [vmem:[#allocation3 + $0x28] sm:$0xff] %vm1713_vm1, %v1897_v25  ;;  %v1804_v21 = vpop.permute.xlu0 %1803  ;;  %v1990_v52 = vld [vmem:[#allocation3 + $0x10] sm:$0xff]  ;;  %v2345_v25 = vld [vmem:[#allocation9 + $0x40] sm:$0xff] }
 0x382   : > { %v1961_v22 = vpop.permute.xlu1 %1960 }
 0x383   : > { %1982 = vst.msk [vmem:[#allocation3 + $0x28] sm:$0xff] %vm1778_vm2, %v1961_v22  ;;  %v1899_v63 = vpop.permute.xlu0 %1898 }
 0x384   : > { %1919 = vst.msk [vmem:[#allocation3 + $0x38] sm:$0xff] %vm1713_vm1, %v1899_v63  ;;  %v1992_v36 = vld [vmem:[#allocation3 + $0x20] sm:$0xff]  ;;  %v2347_v63 = vld [vmem:[#allocation9 + $0x50] sm:$0xff] }
 0x386   : > { %v1696_v46 = vpop.permute.xlu1 %1695 }
 0x387   : > { %1717 = vst.msk [vmem:[#allocation3 + $0x30] sm:$0xff] %vm1713_vm1, %v1696_v46  ;;  %v1963_v20 = vpop.permute.xlu0 %1962  ;;  %v2348_v46 = vld [vmem:[#allocation9 + $0x58] sm:$0xff] }
 0x388   : > { %1983 = vst.msk [vmem:[#allocation3 + $0x38] sm:$0xff] %vm1778_vm2, %v1963_v20  ;;  %v4549_v20 = vpack.c.bf16 %v2348_v46, %v2347_v63  ;;  %v2352_v46 = vld [vmem:[#allocation9 + $0x78] sm:$0xff] }
 0x38a   : > { %v1761_v10 = vpop.permute.xlu1 %1760  ;;  %v1993_v54 = vld [vmem:[#allocation3 + $0x28] sm:$0xff] }
 0x38b   : > { %1782 = vst.msk [vmem:[#allocation3 + $0x30] sm:$0xff] %vm1778_vm2, %v1761_v10  ;;  %v1698_v8 = vpop.permute.xlu0 %1697  ;;  %v594_v10 = vld [vmem:[%s3525_s14] sm:$0xff] }
 0x38c   : > { %1823 = vst.msk [vmem:[#allocation3 + $0x30] sm:$0xff] %vm1819_vm4, %v1802_v39  ;;  %v2344_v39 = vld [vmem:[#allocation9 + $0x38] sm:$0xff] }
 0x38d   : > { %1718 = vst.msk [vmem:[#allocation3 + $0x40] sm:$0xff] %vm1713_vm1, %v1698_v8  ;;  %v4541_v33 = vpack.c.bf16 %v2344_v39, %v2343_v17 }
 0x38e   : > { %v1901_v26 = vpop.permute.xlu1 %1900 }
 0x38f   : > { %1920 = vst.msk [vmem:[#allocation3 + $0x48] sm:$0xff] %vm1713_vm1, %v1901_v26  ;;  %v1763_v15 = vpop.permute.xlu0 %1762  ;;  %v1995_v51 = vld [vmem:[#allocation3 + $0x38] sm:$0xff]  ;;  %v4558_v26 = vld [vmem:[%s4650_s7] ss:$0 sm:$0xff] }
 0x390   : > { %1783 = vst.msk [vmem:[#allocation3 + $0x40] sm:$0xff] %vm1778_vm2, %v1763_v15 }
 0x391   : > { %1824 = vst.msk [vmem:[#allocation3 + $0x40] sm:$0xff] %vm1819_vm4, %v1804_v21  ;;  %v2346_v21 = vld [vmem:[#allocation9 + $0x48] sm:$0xff] }
 0x392   : > { %v1965_v16 = vpop.permute.xlu1 %1964  ;;  %v4545_v22 = vpack.c.bf16 %v2346_v21, %v2345_v25  ;;  %v2350_v25 = vld [vmem:[#allocation9 + $0x68] sm:$0xff]  ;;  %v2351_v21 = vld [vmem:[#allocation9 + $0x70] sm:$0xff] }
 0x393   : > { %1984 = vst.msk [vmem:[#allocation3 + $0x48] sm:$0xff] %vm1778_vm2, %v1965_v16  ;;  %v1690_v12 = vpop.permute.xlu0 %1689  ;;  %v1994_v24 = vld [vmem:[#allocation3 + $0x30] sm:$0xff] }
 0x394   : > { %1714 = vst.msk [vmem:[#allocation3] sm:$0xff] %vm1713_vm1, %v1690_v12  ;;  %v595_v12 = vld [vmem:[%s3525_s14 + $0x8] sm:$0xff] }
 0x396   : > { %v1700_v11 = vpop.permute.xlu1 %1699 }
 0x397   : > { %1719 = vst.msk [vmem:[#allocation3 + $0x50] sm:$0xff] %vm1713_vm1, %v1700_v11  ;;  %v1755_v60 = vpop.permute.xlu0 %1754 }
 0x398   : > { %1779 = vst.msk [vmem:[#allocation3] sm:$0xff] %vm1778_vm2, %v1755_v60  ;;  %v1996_v3 = vld [vmem:[#allocation3 + $0x40] sm:$0xff] }
 0x399   : > { %1820 = vst.msk [vmem:[#allocation3] sm:$0xff] %vm1819_vm4, %v1796_v0  ;;  %v2337_v0 = vld [vmem:[#allocation9] sm:$0xff] }
 0x39a   : > { %v1765_v19 = vpop.permute.xlu1 %1764  ;;  %v1997_v31 = vld [vmem:[#allocation3 + $0x48] sm:$0xff]  ;;  %v2972_v2 = vpack.c.bf16 %v2338_v55, %v2337_v0  ;;  %v601_v0 = vld [vmem:[%s3525_s14 + $0x38] sm:$0xff] }
 0x39b   : > { %1784 = vst.msk [vmem:[#allocation3 + $0x50] sm:$0xff] %vm1778_vm2, %v1765_v19  ;;  %v1903_v27 = vpop.permute.xlu0 %1902 }
 0x39c   : > { %1921 = vst.msk [vmem:[#allocation3 + $0x58] sm:$0xff] %vm1713_vm1, %v1903_v27  ;;  %2973 = vmatprep.subr.bf16.mxu0 %v2972_v2  ;;  %3004 = vmatprep.subr.bf16.mxu1 %v2972_v2 }
 0x39e   : > { %v1806_v28 = vpop.permute.xlu1 %1805 }
 0x39f   : > { %1825 = vst.msk [vmem:[#allocation3 + $0x50] sm:$0xff] %vm1819_vm4, %v1806_v28  ;;  %v1967_v42 = vpop.permute.xlu0 %1966 }
 0x3a0   : > { %1985 = vst.msk [vmem:[#allocation3 + $0x58] sm:$0xff] %vm1778_vm2, %v1967_v42  ;;  %v1988_v44 = vld [vmem:[#allocation3] sm:$0xff]  ;;  %v596_v42 = vld [vmem:[%s3525_s14 + $0x10] sm:$0xff] }
 0x3a1   : > { %2122 = vmatmul.mubr.f32.vlgmr.msra.gmra.mrb[0].mxu0 %v1988_v44 }
 0x3a2   : > { %v1905_v43 = vpop.permute.xlu1 %1904  ;;  %2631 = vmatprep.mubr.msk.f32.mxu0 %vm2032_vm3, %v1991_v23  ;;  %2975 = vmatpush3.bf16.msra.mxu0 %v2972_v2 }
 0x3a3   : > { %1922 = vst.msk [vmem:[#allocation3 + $0x68] sm:$0xff] %vm1713_vm1, %v1905_v43  ;;  %v1702_v13 = vpop.permute.xlu0 %1701  ;;  %2977 = vmatprep.subr.bf16.mxu0 %v4534_v59 }
 0x3a4   : > { %1720 = vst.msk [vmem:[#allocation3 + $0x60] sm:$0xff] %vm1713_vm1, %v1702_v13 }
 0x3a5   : > { %2127 = vmatmul.mubr.f32.gmra.mrb[2].mxu0 %v1990_v52 }
 0x3a6   : > { %v1969_v41 = vpop.permute.xlu1 %1968  ;;  %2632 = vmatprep.mubr.msk.f32.mxu0 %vm2032_vm3, %v1993_v54  ;;  %v1998_v9 = vld [vmem:[#allocation3 + $0x50] sm:$0xff]  ;;  %2979 = vmatpush3.bf16.msra.mxu0 %v4534_v59 }
 0x3a7   : > { %1986 = vst.msk [vmem:[#allocation3 + $0x68] sm:$0xff] %vm1778_vm2, %v1969_v41  ;;  %v1767_v56 = vpop.permute.xlu0 %1766  ;;  %v1999_v6 = vld [vmem:[#allocation3 + $0x58] sm:$0xff]  ;;  %2981 = vmatprep.subr.bf16.mxu0 %v4537_v32 }
 0x3a8   : > { %1785 = vst.msk [vmem:[#allocation3 + $0x60] sm:$0xff] %vm1778_vm2, %v1767_v56  ;;  %v597_v41 = vld [vmem:[%s3525_s14 + $0x18] sm:$0xff] }
 0x3a9   : > { %2132 = vmatmul.mubr.f32.gmra.mrb[4].mxu0 %v1992_v36 }
 0x3aa   : > { %v1704_v47 = vpop.permute.xlu1 %1703  ;;  %2633 = vmatprep.mubr.msk.f32.mxu0 %vm2032_vm3, %v1995_v51  ;;  %2983 = vmatpush3.bf16.msra.mxu0 %v4537_v32 }
 0x3ab   : > { %1721 = vst.msk [vmem:[#allocation3 + $0x70] sm:$0xff] %vm1713_vm1, %v1704_v47  ;;  %v1808_v49 = vpop.permute.xlu0 %1807  ;;  %2985 = vmatprep.subr.bf16.mxu0 %v4541_v33 }
 0x3ac   : > { %1826 = vst.msk [vmem:[#allocation3 + $0x60] sm:$0xff] %vm1819_vm4, %v1808_v49 }
 0x3ad   : > { %2137 = vmatmul.mubr.f32.gmra.mrb[6].mxu0 %v1994_v24 }
 0x3ae   : > { %v1769_v40 = vpop.permute.xlu1 %1768  ;;  %2634 = vmatprep.mubr.msk.f32.mxu0 %vm2032_vm3, %v1997_v31  ;;  %v2001_v45 = vld [vmem:[#allocation3 + $0x68] sm:$0xff]  ;;  %2987 = vmatpush3.bf16.msra.mxu0 %v4541_v33  ;;  %v598_v31 = vld [vmem:[%s3525_s14 + $0x20] sm:$0xff] }
 0x3af   : > { %1786 = vst.msk [vmem:[#allocation3 + $0x70] sm:$0xff] %vm1778_vm2, %v1769_v40  ;;  %v1907_v58 = vpop.permute.xlu0 %1906  ;;  %2989 = vmatprep.subr.bf16.mxu0 %v4545_v22 }
 0x3b0   : > { %1923 = vst.msk [vmem:[#allocation3 + $0x78] sm:$0xff] %vm1713_vm1, %v1907_v58 }
 0x3b1   : > { %2142 = vmatmul.mubr.f32.gmra.mrb[8].mxu0 %v1996_v3 }
 0x3b2   : > { %v1810_v61 = vpop.permute.xlu1 %1809  ;;  %2635 = vmatprep.mubr.msk.f32.mxu0 %vm2032_vm3, %v1999_v6  ;;  %2991 = vmatpush3.bf16.msra.mxu0 %v4545_v22 }
 0x3b3   : > { %1827 = vst.msk [vmem:[#allocation3 + $0x70] sm:$0xff] %vm1819_vm4, %v1810_v61  ;;  %v1971_v38 = vpop.permute.xlu0 %1970  ;;  %v2000_v18 = vld [vmem:[#allocation3 + $0x60] sm:$0xff]  ;;  %2993 = vmatprep.subr.bf16.mxu0 %v4549_v20 }
 0x3b4   : > { %1987 = vst.msk [vmem:[#allocation3 + $0x78] sm:$0xff] %vm1778_vm2, %v1971_v38 }
 0x3b5   : > { %2147 = vmatmul.mubr.f32.gmra.mrb[10].mxu0 %v1998_v9  ;;  %v599_v9 = vld [vmem:[%s3525_s14 + $0x28] sm:$0xff]  ;;  %s4599_s14 = scalar_lea.hbm %s4700_s18, %s2648_s13 }
 0x3b6   : > { %2636 = vmatprep.mubr.msk.f32.mxu0 %vm2032_vm3, %v2001_v45  ;;  %2995 = vmatpush3.bf16.msra.mxu0 %v4549_v20 }
 0x3b9   : > { %2152 = vmatmul.mubr.f32.gmra.mrb[12].mxu0 %v2000_v18 }
 0x3ba   : > { %v2002_v7 = vld [vmem:[#allocation3 + $0x70] sm:$0xff] }
 0x3bb   : > { %v2003_v34 = vld [vmem:[#allocation3 + $0x78] sm:$0xff] }
 0x3bc   : > { %2637 = vmatprep.mubr.msk.f32.mxu0 %vm2032_vm3, %v2003_v34 }
 0x3bd   : > { %2157 = vmatmul.mubr.f32.gmra.mrb[14].mxu0 %v2002_v7 }
 0x474   : > { %v2123_v8 = vpop.f32.mrb[0].mxu0 }
 0x475   : > { %v2124_v15 = vadd.f32 %v2123_v8, %v594_v10  ;;  %v2125_v16 = vpop.f32.mrb[1].mxu0  ;;  %v3000_v10 = vpack.c.bf16 %v2352_v46, %v2351_v21 }
 0x477   : > { %v2169_v11 = vadd.f32 %v4558_v26, %v2124_v15 }
 0x478   : > { %v2128_v60 = vpop.f32.mrb[2].mxu0 }
 0x479   : > { %v2177_v19 = vmul.f32 0.2, %v2169_v11  ;;  %v2129_v27 = vadd.f32 %v2128_v60, %v595_v12  ;;  %v2130_v28 = vpop.f32.mrb[3].mxu0 }
 0x47b   : > { %v2170_v44 = vadd.f32 %v4558_v26, %v2129_v27  ;;  %v2185_v23 = vmax.f32 %v2169_v11, %v2177_v19 }
 0x47c   : > { %v2133_v43 = vpop.f32.mrb[4].mxu0 }
 0x47d   : > { %v2178_v13 = vmul.f32 0.2, %v2170_v44  ;;  %v2134_v52 = vadd.f32 %v2133_v43, %v596_v42  ;;  %v2135_v54 = vpop.f32.mrb[5].mxu0  ;;  %2814 = vmatprep.mubr.f32.mxu1 %v2185_v23 }
 0x47f   : > { %v2186_v56 = vmax.f32 %v2170_v44, %v2178_v13  ;;  %v2171_v36 = vadd.f32 %v4558_v26, %v2134_v52 }
 0x480   : > { %v2138_v51 = vpop.f32.mrb[6].mxu0 }
 0x481   : > { %v2179_v47 = vmul.f32 0.2, %v2171_v36  ;;  %v2139_v49 = vadd.f32 %v2138_v51, %v597_v41  ;;  %v2140_v24 = vpop.f32.mrb[7].mxu0  ;;  %2815 = vmatmul.mubr.f32.vlgmr.msra.gmra.mrb[16].mxu1 %v2186_v56 }
 0x482   : > { %3012 = vmatpush3.bf16.msra.mxu1 %v2972_v2 }
 0x483   : > { %v2172_v40 = vadd.f32 %v4558_v26, %v2139_v49  ;;  %v2187_v58 = vmax.f32 %v2171_v36, %v2179_v47  ;;  %3005 = vmatprep.subr.bf16.mxu1 %v4534_v59 }
 0x484   : > { %v2143_v3 = vpop.f32.mrb[8].mxu0 }
 0x485   : > { %v2180_v6 = vmul.f32 0.2, %v2172_v40  ;;  %v2144_v61 = vadd.f32 %v2143_v3, %v598_v31  ;;  %v2145_v38 = vpop.f32.mrb[9].mxu0  ;;  %2817 = vmatprep.mubr.f32.mxu1 %v2187_v58 }
 0x486   : > { %3013 = vmatpush3.bf16.msra.mxu1 %v4534_v59 }
 0x487   : > { %v2173_v45 = vadd.f32 %v4558_v26, %v2144_v61  ;;  %v2188_v18 = vmax.f32 %v2172_v40, %v2180_v6  ;;  %3006 = vmatprep.subr.bf16.mxu1 %v4537_v32 }
 0x488   : > { %v2148_v34 = vpop.f32.mrb[10].mxu0 }
 0x489   : > { %v2181_v7 = vmul.f32 0.2, %v2173_v45  ;;  %v2149_v48 = vadd.f32 %v2148_v34, %v599_v9  ;;  %v2150_v4 = vpop.f32.mrb[11].mxu0  ;;  %2818 = vmatmul.mubr.f32.gmra.mrb[18].mxu1 %v2188_v18  ;;  %v2640_v9 = vld [vmem:[%s4698_s16] ss:$0 sm:$0xff]  ;;  %s3191_s16 = scalar_lea.vmem %s3190_s30, 2048 }
 0x48a   : > { %3014 = vmatpush3.bf16.msra.mxu1 %v4537_v32  ;;  %p3193_p12 = scmp.lt.s32.totalorder %s3191_s16, %s3185_s26 }
 0x48b   : > { %v2174_v37 = vadd.f32 %v4558_v26, %v2149_v48  ;;  %v2189_v57 = vmax.f32 %v2173_v45, %v2181_v7  ;;  %3007 = vmatprep.subr.bf16.mxu1 %v4541_v33 }
 0x48c   : > { %v2153_v50 = vpop.f32.mrb[12].mxu0  ;;  %p3194_p1 = por %p3193_p12, %p3192_p9 }
 0x48d   : > { %v2182_v53 = vmul.f32 0.2, %v2174_v37  ;;  %v2154_v62 = vadd.f32 %v2153_v50, %v600_v35  ;;  %v2155_v14 = vpop.f32.mrb[13].mxu0  ;;  %2820 = vmatprep.mubr.f32.mxu1 %v2189_v57 }
 0x48e   : > { %3015 = vmatpush3.bf16.msra.mxu1 %v4541_v33  ;;  %v2349_v33 = vld [vmem:[#allocation9 + $0x60] sm:$0xff]  ;;  %p3195_p13 = pnand %p3194_p1, %p3188_p7 }
 0x48f   : > { %v2175_v55 = vadd.f32 %v4558_v26, %v2154_v62  ;;  %v2190_v1 = vmax.f32 %v2174_v37, %v2182_v53  ;;  %3008 = vmatprep.subr.bf16.mxu1 %v4545_v22  ;;  %v2996_v63 = vpack.c.bf16 %v2350_v25, %v2349_v33 }
 0x490   : > { %v2158_v2 = vpop.f32.mrb[14].mxu0 }
 0x491   : > { %v2183_v30 = vmul.f32 0.2, %v2175_v55  ;;  %v2159_v59 = vadd.f32 %v2158_v2, %v601_v0  ;;  %v2160_v29 = vpop.f32.mrb[15].mxu0  ;;  %2821 = vmatmul.mubr.f32.gmra.mrb[20].mxu1 %v2190_v1  ;;  %2997 = vmatprep.subr.bf16.mxu0 %v2996_v63 }
 0x492   : > { %3016 = vmatpush3.bf16.msra.mxu1 %v4545_v22  ;;  %2999 = vmatpush3.bf16.msra.mxu0 %v2996_v63  ;;  %v2639_v22 = vld [vmem:[%s4652_s9] ss:$0 sm:$0xff] }
 0x493   : > { %v2176_v5 = vadd.f32 %v4558_v26, %v2159_v59  ;;  %v2191_v32 = vmax.f32 %v2175_v55, %v2183_v30  ;;  %3009 = vmatprep.subr.bf16.mxu1 %v4549_v20  ;;  %3001 = vmatprep.subr.bf16.mxu0 %v3000_v10 }
 0x495   : > { %v2184_v17 = vmul.f32 0.2, %v2176_v5  ;;  %2823 = vmatprep.mubr.f32.mxu1 %v2191_v32 }
 0x496   : > { %3017 = vmatpush3.bf16.msra.mxu1 %v4549_v20  ;;  %3003 = vmatpush3.bf16.msra.mxu0 %v3000_v10 }
 0x497   : > { %v2192_v39 = vmax.f32 %v2176_v5, %v2184_v17  ;;  %3010 = vmatprep.subr.bf16.mxu1 %v2996_v63 }
 0x499   : > { %2824 = vmatmul.mubr.f32.gmra.mrb[22].mxu1 %v2192_v39 }
 0x49a   : > { %3018 = vmatpush3.bf16.msra.mxu1 %v2996_v63 }
 0x49b   : > { %3011 = vmatprep.subr.bf16.mxu1 %v3000_v10 }
 0x49e   : > { %3019 = vmatpush3.bf16.msra.mxu1 %v3000_v10 }
 0x554   : > { %v2816_v20 = vpop.f32.mrb[16].mxu1 }
 0x555   : > { %v2288_v8 = vadd.f32 %v2816_v20, %v2639_v22  ;;  %v2282_v26 = vpop.f32.mrb[17].mxu1 }
 0x556   : > { %v2283_v15 = vadd.f32 %v2639_v22, %v2282_v26 }
 0x557   : > { %v2322_v16 = vmul.f32 0.2, %v2288_v8 }
 0x558   : > { %v2321_v12 = vmul.f32 0.2, %v2283_v15 }
 0x559   : > { %v2330_v60 = vmax.f32 %v2288_v8, %v2322_v16 }
 0x55a   : > { %v2329_v11 = vmax.f32 %v2283_v15, %v2321_v12 }
 0x55c   : > { %v2819_v19 = vpop.f32.mrb[18].mxu1  ;;  %2858 = vmatprep.mubr.f32.mxu0 %v2329_v11 }
 0x55d   : > { %v2298_v27 = vadd.f32 %v2819_v19, %v2639_v22  ;;  %v2292_v28 = vpop.f32.mrb[19].mxu1  ;;  %2859 = vmatmul.mubr.f32.vlgmr.msra.gmra.mrb[16].mxu0 %v2330_v60 }
 0x55e   : > { %v2293_v42 = vadd.f32 %v2639_v22, %v2292_v28 }
 0x55f   : > { %v2324_v44 = vmul.f32 0.2, %v2298_v27 }
 0x560   : > { %v2323_v23 = vmul.f32 0.2, %v2293_v42 }
 0x561   : > { %v2332_v13 = vmax.f32 %v2298_v27, %v2324_v44 }
 0x562   : > { %v2331_v43 = vmax.f32 %v2293_v42, %v2323_v23 }
 0x564   : > { %v2822_v52 = vpop.f32.mrb[20].mxu1  ;;  %2861 = vmatprep.mubr.f32.mxu0 %v2331_v43 }
 0x565   : > { %v2308_v54 = vadd.f32 %v2822_v52, %v2639_v22  ;;  %v2302_v41 = vpop.f32.mrb[21].mxu1  ;;  %2862 = vmatmul.mubr.f32.gmra.mrb[18].mxu0 %v2332_v13 }
 0x566   : > { %v2303_v56 = vadd.f32 %v2639_v22, %v2302_v41 }
 0x567   : > { %v2326_v36 = vmul.f32 0.2, %v2308_v54 }
 0x568   : > { %v2325_v51 = vmul.f32 0.2, %v2303_v56 }
 0x569   : > { %v2334_v49 = vmax.f32 %v2308_v54, %v2326_v36 }
 0x56a   : > { %v2333_v47 = vmax.f32 %v2303_v56, %v2325_v51 }
 0x56c   : > { %v2825_v24 = vpop.f32.mrb[22].mxu1  ;;  %2864 = vmatprep.mubr.f32.mxu0 %v2333_v47 }
 0x56d   : > { %v2318_v31 = vadd.f32 %v2825_v24, %v2639_v22  ;;  %v2312_v40 = vpop.f32.mrb[23].mxu1  ;;  %2865 = vmatmul.mubr.f32.gmra.mrb[20].mxu0 %v2334_v49 }
 0x56e   : > { %v2313_v58 = vadd.f32 %v2639_v22, %v2312_v40 }
 0x56f   : > { %v2328_v3 = vmul.f32 0.2, %v2318_v31 }
 0x570   : > { %v2327_v6 = vmul.f32 0.2, %v2313_v58 }
 0x571   : > { %v2336_v38 = vmax.f32 %v2318_v31, %v2328_v3 }
 0x572   : > { %v2335_v61 = vmax.f32 %v2313_v58, %v2327_v6 }
 0x574   : > { %2867 = vmatprep.mubr.f32.mxu1 %v2335_v61 }
 0x575   : > { %2868 = vmatmul.mubr.f32.vlgmr.msra.gmra.mrb[24].mxu1 %v2336_v38 }
 0x630   : > { %v2860_v45 = vpop.f32.mrb[16].mxu0 }
 0x631   : > { %v2432_v18 = vadd.f32 %v2860_v45, %v2640_v9  ;;  %v2426_v34 = vpop.f32.mrb[17].mxu0 }
 0x632   : > { %v2427_v7 = vadd.f32 %v2640_v9, %v2426_v34 }
 0x633   : > { %2466 = vst [vmem:[%s475_s11 + $0x8] sm:$0xff] %v2432_v18 }
 0x634   : > { %2465 = vst [vmem:[%s475_s11] sm:$0xff] %v2427_v7 }
 0x638   : > { %v2863_v48 = vpop.f32.mrb[18].mxu0 }
 0x639   : > { %v2442_v4 = vadd.f32 %v2863_v48, %v2640_v9  ;;  %v2436_v35 = vpop.f32.mrb[19].mxu0 }
 0x63a   : > { %v2437_v37 = vadd.f32 %v2640_v9, %v2436_v35 }
 0x63b   : > { %2468 = vst [vmem:[%s475_s11 + $0x18] sm:$0xff] %v2442_v4 }
 0x63c   : > { %2467 = vst [vmem:[%s475_s11 + $0x10] sm:$0xff] %v2437_v37 }
 0x640   : > { %v2866_v57 = vpop.f32.mrb[20].mxu0 }
 0x641   : > { %v2452_v50 = vadd.f32 %v2866_v57, %v2640_v9  ;;  %v2446_v53 = vpop.f32.mrb[21].mxu0 }
 0x642   : > { %v2447_v62 = vadd.f32 %v2640_v9, %v2446_v53 }
 0x643   : > { %2470 = vst [vmem:[%s475_s11 + $0x28] sm:$0xff] %v2452_v50 }
 0x644   : > { %2469 = vst [vmem:[%s475_s11 + $0x20] sm:$0xff] %v2447_v62 }
 0x648   : > { %v2869_v14 = vpop.f32.mrb[24].mxu1 }
 0x649   : > { %v2462_v0 = vadd.f32 %v2869_v14, %v2640_v9  ;;  %v2456_v55 = vpop.f32.mrb[25].mxu1 }
 0x64a   : > { %v2457_v1 = vadd.f32 %v2640_v9, %v2456_v55 }
 0x64b   : > { %2472 = vst [vmem:[%s475_s11 + $0x38] sm:$0xff] %v2462_v0 }
 0x64c   : > { %2471 = vst [vmem:[%s475_s11 + $0x30] sm:$0xff] %v2457_v1 }
 0x64d   : > { %3198 = shalt.err (!%p3195_p13)
}
 0x64e   : > { %s3199_s29 = scalar_lea.hbm %s4599_s14, 1024  ;;  %s3203_s27 = scalar_lea.hbm %s4700_s18, 2048 }
 0x64f   : > { %p3200_p6 = scmp.ne.s32.totalorder %s4599_s14, %s3199_s29  ;;  %p3204_p5 = scmp.lt.u32.totalorder %s4599_s14, %s4700_s18 }
 0x650   : > { %p3205_p8 = scmp.lt.u32.totalorder %s3203_s27, %s3199_s29  ;;  %p3207_p0 = scmp.lt.u32.totalorder %s3199_s29, %s4599_s14 }
 0x651   : > { %p3201_p10 = pnand %p3200_p6, %p4701_p2 }
 0x652   : > { %p3206_p11 = por %p3205_p8, %p3204_p5 }
 0x653   : > { %p3202_p4 = pneg %p3201_p10 }
 0x654   : > { %p3208_p3 = por %p3207_p0, %p3206_p11 }
 0x656   : > { %p3209_p7 = pnand %p3208_p3, %p3202_p4 }
 0x658   : > { %3212 = shalt.err (!%p3209_p7)
}
 0x659   : > { %s3271_s26 = smov 128   ;;  %s3272_s30 = smov 8  }
 0x65a   : > { %3030 = dma.vmem_to_hbm [thread:$0]  (%p4701_p2), %s4594_s15, 1024, %s4599_s14, %s2474_s17, %s3271_s26, %s3271_s26, %s3272_s30  }
 0x65b PF: > { %s4702_s16 = sld [smem:[#allocation14_spill]]  ;;  %s4703_s11 = sld [smem:[#allocation15_spill]] }
 0x65c   : > { %p4705_p12 = scmp.ge.s32.totalorder %s3255_s24, 2 }
 0x661   : > { %s2502_s13 = sand.u32 1, %s4702_s16   ;;  %p4704_p9 = scmp.ne.s32.totalorder %s4703_s11, 0 }
 0x662   : > { %s2503_s29 = scalar_lea.sflag [#allocation6], %s2502_s13 }
 0x663   : > { %p3044_p1 = pnand %p4705_p12, %p4704_p9 }
 0x665   : > { %3238 = dma.done.wait (!%p3044_p1), %s2503_s29, 1024  }
 0x666   : > { %3240 = vsyncadd (!%p3044_p1), %s2503_s29, 4294966272  ;;  %s4706_s27 = smov %s3454_s21  ;;  %p26_p13 = scmp.ge.s32.totalorder %s3454_s21, 4  }
 0x667   : > { %s4707_s21 = smov %s3247_s22  ;;  %s4708_s22 = smov %s3251_s23 }
 0x668   : > { %s4709_s23 = smov %s3470_s20  ;;  %s4710_s24 = smov %s4706_s27 }
 0x669   :  { %28 = sbr.rel (!%p26_p13) target bundleno = 9 (0x9), region = 124 }
 0x670   :  { %2508 = vsyncpa [#allocation5], 1 }
 0x671   :  { %2510 = vsyncpa [#allocation5 + $0x1], 1 }
 0x672   :  { %2511 = vsyncpa [#allocation8], 1 }
 0x673   :  { %2512 = vsyncpa [#allocation6], 1 }
 0x674   :  { %2514 = vsyncpa [#allocation6 + $0x1], 1 }

</bundles_post_ra>
